<compile_context>
chip_gen: v6e
topology: v6e:2x2x1
jax: 0.10.0
libtpu: 0.0.40
codegen_flags: <defaults>
</compile_context>

<pallas_src>
import functools

import jax
import jax.numpy as jnp
from jax.experimental import pallas as pl
from jax.experimental.pallas import tpu as pltpu


# ----------------------------------------------------------------------------
# In-kernel math helpers.
# ----------------------------------------------------------------------------

def _gelu_tanh(x):
    # TODO(synk): HF BERT's default GELU is the exact erf form; tanh approx is
    # used because erf has no guaranteed Mosaic lowering (small numeric delta).
    return 0.5 * x * (1.0 + jnp.tanh(0.7978845608028654 * (x + 0.044715 * x * x * x)))


def _layernorm(v, g, b, eps=1e-12):
    mu = jnp.mean(v, axis=-1, keepdims=True)
    var = jnp.mean(jnp.square(v - mu), axis=-1, keepdims=True)
    return (v - mu) * jax.lax.rsqrt(var + eps) * g + b


# ----------------------------------------------------------------------------
# The single fused kernel.
# ----------------------------------------------------------------------------

def _make_fused_kernel(*, B, S, nH, Dh, H, L):
    T = B * S
    scale = 1.0 / float(Dh) ** 0.5

    def kernel(xemb_ref, mask_ref, embg_ref, embb_ref,
               wqkv_ref, bqkv_ref, wo_ref, bo_ref, ln1g_ref, ln1b_ref,
               wi_ref, bi_ref, wo2_ref, bo2_ref, ln2g_ref, ln2b_ref,
               poolw_ref, poolb_ref, w1_ref, b1_ref, w2_ref, b2_ref,
               w3_ref, b3_ref,
               o_ref, x_sc, ctx_sc):
        l = pl.program_id(0)

        # ---- step-0 prologue: embedding LayerNorm (fused, no extra kernel) ---
        @pl.when(l == 0)
        def _():
            x_sc[...] = _layernorm(xemb_ref[...], embg_ref[...], embb_ref[...])

        x = x_sc[...]                                           # (T, H) f32
        xb = x.astype(jnp.bfloat16)

        # ---- fused QKV projection: single K=H, N=3H bf16 MXU pass ------------
        qkv = jnp.dot(xb, wqkv_ref[0],
                      preferred_element_type=jnp.float32) + bqkv_ref[0]

        # Additive key mask broadcast over query rows inside the kernel
        # (depends only on key position; never pre-broadcast in HBM).
        neg = mask_ref[...].reshape(B, 1, S)                    # (B, 1, S)

        # ---- attention: batched over B via dot_general batch dims.  Small
        # static loop over heads writes each head's context into a (T, H)
        # VMEM scratch at its lane offset so Wo is applied once at full K.
        # TODO(synk): at real shapes heads/batch become grid axes and per-head
        # (S, Dh) tiles are DMA-delivered instead of lane-sliced in registers.
        for h in range(nH):
            c0 = h * Dh
            q3 = qkv[:, c0:c0 + Dh].reshape(B, S, Dh).astype(jnp.bfloat16)
            k3 = qkv[:, H + c0:H + c0 + Dh].reshape(B, S, Dh).astype(jnp.bfloat16)
            v3 = qkv[:, 2 * H + c0:2 * H + c0 + Dh].reshape(B, S, Dh).astype(jnp.bfloat16)

            s = jnp.einsum('bqd,bkd->bqk', q3, k3,
                           preferred_element_type=jnp.float32) * scale
            s = s + neg
            s = s - jnp.max(s, axis=-1, keepdims=True)
            p = jnp.exp(s)
            p = p * pl.reciprocal(jnp.sum(p, axis=-1, keepdims=True), approx=True)
            ctx = jnp.einsum('bqk,bkd->bqd', p.astype(jnp.bfloat16), v3,
                             preferred_element_type=jnp.float32)   # (B, S, Dh)
            ctx_sc[:, c0:c0 + Dh] = ctx.reshape(T, Dh)

        # ---- single full-K out-projection + add & LayerNorm -------------------
        attn = jnp.dot(ctx_sc[...].astype(jnp.bfloat16), wo_ref[0],
                       preferred_element_type=jnp.float32) + bo_ref[0]
        x1 = _layernorm(attn + x, ln1g_ref[0], ln1b_ref[0])

        # ---- FFN: up-proj + GELU + down-proj + add & LayerNorm ----------------
        mid = jnp.dot(x1.astype(jnp.bfloat16), wi_ref[0],
                      preferred_element_type=jnp.float32) + bi_ref[0]
        mid = _gelu_tanh(mid)
        ffn = jnp.dot(mid.astype(jnp.bfloat16), wo2_ref[0],
                      preferred_element_type=jnp.float32) + bo2_ref[0]
        x_new = _layernorm(ffn + x1, ln2g_ref[0], ln2b_ref[0])
        x_sc[...] = x_new                                       # feeds next layer

        # ---- final step: pooler ([CLS] Linear + tanh) + feasibility MLP head --
        @pl.when(l == L - 1)
        def _():
            # [CLS] rows sit at b*S; B is tiny so a static row gather is fine.
            cls = jnp.concatenate(
                [x_new[b * S:b * S + 1, :] for b in range(B)], axis=0)  # (B, H)
            pooled = jnp.tanh(
                jnp.dot(cls.astype(jnp.bfloat16), poolw_ref[...],
                        preferred_element_type=jnp.float32) + poolb_ref[...])
            # Dropout(p=0.1) is identity at inference.
            # TODO(synk): training-mode stochastic dropout (pltpu.prng_*) not emitted.
            z = jnp.maximum(
                jnp.dot(pooled.astype(jnp.bfloat16), w1_ref[...],
                        preferred_element_type=jnp.float32) + b1_ref[...], 0.0)
            z = jnp.maximum(
                jnp.dot(z.astype(jnp.bfloat16), w2_ref[...],
                        preferred_element_type=jnp.float32) + b2_ref[...], 0.0)
            o_ref[...] = jnp.dot(z.astype(jnp.bfloat16), w3_ref[...],
                                 preferred_element_type=jnp.float32) + b3_ref[...]

    return kernel


def fused_bert_forward(xemb, addmask, prep, *, batch, seq, num_heads):
    T, H = xemb.shape
    L = prep["wqkv"].shape[0]
    C = prep["w3"].shape[1]
    Dh = H // num_heads

    def full_spec(a):                     # same block every grid step (resident)
        nd = a.ndim
        return pl.BlockSpec(a.shape, lambda *_: (0,) * nd)

    def layer_spec(a):                    # layer l's slice of a stacked (L,...) array
        nd = a.ndim
        return pl.BlockSpec((1,) + a.shape[1:], lambda l: (l,) + (0,) * (nd - 1))

    args = (
        xemb, addmask, prep["emb_g"], prep["emb_b"],
        prep["wqkv"], prep["bqkv"], prep["wo"], prep["bo"],
        prep["ln1_g"], prep["ln1_b"], prep["wi"], prep["bi"],
        prep["wo2"], prep["bo2"], prep["ln2_g"], prep["ln2_b"],
        prep["pool_w"], prep["pool_b"],
        prep["w1"], prep["b1"], prep["w2"], prep["b2"], prep["w3"], prep["b3"],
    )
    in_specs = ([full_spec(a) for a in args[:4]]
                + [layer_spec(a) for a in args[4:16]]
                + [full_spec(a) for a in args[16:]])

    return pl.pallas_call(
        _make_fused_kernel(B=batch, S=seq, nH=num_heads, Dh=Dh, H=H, L=L),
        out_shape=jax.ShapeDtypeStruct((batch, C), jnp.float32),
        grid_spec=pltpu.PrefetchScalarGridSpec(
            num_scalar_prefetch=0,
            grid=(L,),                                   # one step per encoder layer
            in_specs=in_specs,
            out_specs=pl.BlockSpec((batch, C), lambda l: (0, 0)),
            scratch_shapes=[pltpu.VMEM((T, H), jnp.float32),   # activations x
                            pltpu.VMEM((T, H), jnp.float32)],  # per-head contexts
        ),
        # Layer axis is a sequential dependence chain -> "arbitrary".
        # TODO(synk): at real shapes add "parallel" (batch/head/row-tile) axes so
        # both v7x TensorCores are used, and set vmem_limit_bytes for the tiling.
        compiler_params=pltpu.CompilerParams(
            dimension_semantics=("arbitrary",)),
    )(*args)


# ----------------------------------------------------------------------------
# Deterministic parameter init (synthetic "pretrained" BERT + heads).
# ----------------------------------------------------------------------------

def init_params(key, *, vocab=100, max_pos=16, type_vocab=2, hidden=32,
                intermediate=64, layers=2, num_classes=3):
    ks = iter(jax.random.split(key, 256))

    def w(shape, scale=0.02):
        return (scale * jax.random.normal(next(ks), shape)).astype(jnp.float32)

    zeros = lambda shape: jnp.zeros(shape, jnp.float32)
    ones = lambda shape: jnp.ones(shape, jnp.float32)

    params = {
        "emb": {
            "word": w((vocab, hidden)), "pos": w((max_pos, hidden)),
            "type": w((type_vocab, hidden)),
            "ln_g": ones((hidden,)), "ln_b": zeros((hidden,)),
        },
        "layers": [],
        "pool_w": w((hidden, hidden)), "pool_b": zeros((hidden,)),
    }
    for _ in range(layers):
        params["layers"].append({
            "wq": w((hidden, hidden)), "bq": zeros((hidden,)),
            "wk": w((hidden, hidden)), "bk": zeros((hidden,)),
            "wv": w((hidden, hidden)), "bv": zeros((hidden,)),
            "wo": w((hidden, hidden)), "bo": zeros((hidden,)),
            "ln1_g": ones((hidden,)), "ln1_b": zeros((hidden,)),
            "wi": w((hidden, intermediate)), "bi": zeros((intermediate,)),
            "wo2": w((intermediate, hidden)), "bo2": zeros((hidden,)),
            "ln2_g": ones((hidden,)), "ln2_b": zeros((hidden,)),
        })

    # circular / market heads are dead code w.r.t. the returned f_logits;
    # only feasibility is materialized and used.
    params["feas"] = {
        "w1": w((hidden, 256)), "b1": zeros((256,)),
        "w2": w((256, 128)), "b2": zeros((128,)),
        "w3": w((128, num_classes)), "b3": zeros((num_classes,)),
    }
    return params


def prepare_params(params):
    """Fuse (QKV concat) + stack per-layer weights + cast to bf16 ONCE, eagerly,
    outside the jitted forward (weights live in HBM already fused/cast)."""
    H = params["emb"]["word"].shape[1]
    L = len(params["layers"])
    stack = lambda name: jnp.stack([lp[name] for lp in params["layers"]])

    wq, wk, wv = stack("wq"), stack("wk"), stack("wv")        # (L, H, H)
    bq, bk, bv = stack("bq"), stack("bk"), stack("bv")        # (L, H)
    inter = params["layers"][0]["wi"].shape[1]

    return {
        "word": params["emb"]["word"], "pos": params["emb"]["pos"],
        "type": params["emb"]["type"],
        "emb_g": params["emb"]["ln_g"].reshape(1, H),
        "emb_b": params["emb"]["ln_b"].reshape(1, H),
        "wqkv": jnp.concatenate([wq, wk, wv], axis=2).astype(jnp.bfloat16),
        "bqkv": jnp.concatenate([bq, bk, bv], axis=1).reshape(L, 1, 3 * H),
        "wo": stack("wo").astype(jnp.bfloat16),
        "bo": stack("bo").reshape(L, 1, H),
        "ln1_g": stack("ln1_g").reshape(L, 1, H),
        "ln1_b": stack("ln1_b").reshape(L, 1, H),
        "wi": stack("wi").astype(jnp.bfloat16),
        "bi": stack("bi").reshape(L, 1, inter),
        "wo2": stack("wo2").astype(jnp.bfloat16),
        "bo2": stack("bo2").reshape(L, 1, H),
        "ln2_g": stack("ln2_g").reshape(L, 1, H),
        "ln2_b": stack("ln2_b").reshape(L, 1, H),
        "pool_w": params["pool_w"].astype(jnp.bfloat16),
        "pool_b": params["pool_b"].reshape(1, H),
        "w1": params["feas"]["w1"].astype(jnp.bfloat16),
        "b1": params["feas"]["b1"].reshape(1, -1),
        "w2": params["feas"]["w2"].astype(jnp.bfloat16),
        "b2": params["feas"]["b2"].reshape(1, -1),
        "w3": params["feas"]["w3"].astype(jnp.bfloat16),
        "b3": params["feas"]["b3"].reshape(1, -1),
    }


# ----------------------------------------------------------------------------
# Forward pass (mirrors BERTClassifier.forward; returns f_logits).
# ----------------------------------------------------------------------------

def bert_classifier_forward(prep, input_ids, attention_mask, *, num_heads):
    B, S = input_ids.shape
    H = prep["word"].shape[1]

    # Embedding lookups + adds are a gather (left to XLA glue); the LayerNorm
    # and everything downstream runs inside the single fused Pallas kernel.
    we = jnp.take(prep["word"], input_ids, axis=0)              # (B, S, H)
    pe = prep["pos"][:S][None, :, :]
    te = prep["type"][0][None, None, :]                         # token_type_ids = 0
    xemb = (we + pe + te).astype(jnp.float32).reshape(B * S, H)

    # HF-style additive key mask at its natural (B, S) size; broadcast across
    # query rows happens inside the kernel.
    addmask = (1.0 - attention_mask.astype(jnp.float32)) * -10000.0

    return fused_bert_forward(xemb, addmask, prep, batch=B, seq=S,
                              num_heads=num_heads)


# ----------------------------------------------------------------------------

if __name__ == "__main__":
    key = jax.random.PRNGKey(0)
    pkey, dkey = jax.random.split(key)

    B, S, HEADS, NUM_CLASSES = 2, 8, 2, 3
    params = init_params(pkey, vocab=100, max_pos=16, hidden=32,
                         intermediate=64, layers=2, num_classes=NUM_CLASSES)
    # Weight fusion + bf16 casts happen exactly once, outside jit.
    prep = prepare_params(params)

    input_ids = jax.random.randint(dkey, (B, S), 0, 100, dtype=jnp.int32)
    attention_mask = jnp.array(
        [[1, 1, 1, 1, 1, 1, 1, 1],
         [1, 1, 1, 1, 1, 0, 0, 0]], dtype=jnp.int32)

    forward = jax.jit(functools.partial(bert_classifier_forward, num_heads=HEADS))
    f_logits = jax.block_until_ready(forward(prep, input_ids, attention_mask))

    assert f_logits.shape == (B, NUM_CLASSES), f_logits.shape
    assert bool(jnp.all(jnp.isfinite(f_logits)))
    print("KERNEL_OK")
</pallas_src>

<mosaic_0001>
module attributes {stable_mosaic.version = 11 : i64} {
  func.func @kernel(%arg0: i32, %arg1: memref<16x32xf32, #tpu.memory_space<vmem>>, %arg2: memref<2x8xf32, #tpu.memory_space<vmem>>, %arg3: memref<1x32xf32, #tpu.memory_space<vmem>>, %arg4: memref<1x32xf32, #tpu.memory_space<vmem>>, %arg5: memref<1x32x96xbf16, #tpu.memory_space<vmem>>, %arg6: memref<1x1x96xf32, #tpu.memory_space<vmem>>, %arg7: memref<1x32x32xbf16, #tpu.memory_space<vmem>>, %arg8: memref<1x1x32xf32, #tpu.memory_space<vmem>>, %arg9: memref<1x1x32xf32, #tpu.memory_space<vmem>>, %arg10: memref<1x1x32xf32, #tpu.memory_space<vmem>>, %arg11: memref<1x32x64xbf16, #tpu.memory_space<vmem>>, %arg12: memref<1x1x64xf32, #tpu.memory_space<vmem>>, %arg13: memref<1x64x32xbf16, #tpu.memory_space<vmem>>, %arg14: memref<1x1x32xf32, #tpu.memory_space<vmem>>, %arg15: memref<1x1x32xf32, #tpu.memory_space<vmem>>, %arg16: memref<1x1x32xf32, #tpu.memory_space<vmem>>, %arg17: memref<32x32xbf16, #tpu.memory_space<vmem>>, %arg18: memref<1x32xf32, #tpu.memory_space<vmem>>, %arg19: memref<32x256xbf16, #tpu.memory_space<vmem>>, %arg20: memref<1x256xf32, #tpu.memory_space<vmem>>, %arg21: memref<256x128xbf16, #tpu.memory_space<vmem>>, %arg22: memref<1x128xf32, #tpu.memory_space<vmem>>, %arg23: memref<128x3xbf16, #tpu.memory_space<vmem>>, %arg24: memref<1x3xf32, #tpu.memory_space<vmem>>, %arg25: memref<2x3xf32, #tpu.memory_space<vmem>>, %arg26: memref<16x32xf32, #tpu.memory_space<vmem>>, %arg27: memref<16x32xf32, #tpu.memory_space<vmem>>) attributes {dimension_semantics = [#tpu.dimension_semantics<arbitrary>], iteration_bounds = array<i64: 2>, scalar_prefetch = 0 : i64, scratch_operands = 2 : i64, tpu.core_type = #tpu.core_type<tc>, window_params = [{pipeline_mode = #tpu.pipeline_mode<synchronous>, transform_indices = @transform_0, window_bounds = array<i64: 16, 32>}, {pipeline_mode = #tpu.pipeline_mode<synchronous>, transform_indices = @transform_1, window_bounds = array<i64: 2, 8>}, {pipeline_mode = #tpu.pipeline_mode<synchronous>, transform_indices = @transform_2, window_bounds = array<i64: 1, 32>}, {pipeline_mode = #tpu.pipeline_mode<synchronous>, transform_indices = @transform_3, window_bounds = array<i64: 1, 32>}, {transform_indices = @transform_4, window_bounds = array<i64: 1, 32, 96>}, {transform_indices = @transform_5, window_bounds = array<i64: 1, 1, 96>}, {transform_indices = @transform_6, window_bounds = array<i64: 1, 32, 32>}, {transform_indices = @transform_7, window_bounds = array<i64: 1, 1, 32>}, {transform_indices = @transform_8, window_bounds = array<i64: 1, 1, 32>}, {transform_indices = @transform_9, window_bounds = array<i64: 1, 1, 32>}, {transform_indices = @transform_10, window_bounds = array<i64: 1, 32, 64>}, {transform_indices = @transform_11, window_bounds = array<i64: 1, 1, 64>}, {transform_indices = @transform_12, window_bounds = array<i64: 1, 64, 32>}, {transform_indices = @transform_13, window_bounds = array<i64: 1, 1, 32>}, {transform_indices = @transform_14, window_bounds = array<i64: 1, 1, 32>}, {transform_indices = @transform_15, window_bounds = array<i64: 1, 1, 32>}, {pipeline_mode = #tpu.pipeline_mode<synchronous>, transform_indices = @transform_16, window_bounds = array<i64: 32, 32>}, {pipeline_mode = #tpu.pipeline_mode<synchronous>, transform_indices = @transform_17, window_bounds = array<i64: 1, 32>}, {pipeline_mode = #tpu.pipeline_mode<synchronous>, transform_indices = @transform_18, window_bounds = array<i64: 32, 256>}, {pipeline_mode = #tpu.pipeline_mode<synchronous>, transform_indices = @transform_19, window_bounds = array<i64: 1, 256>}, {pipeline_mode = #tpu.pipeline_mode<synchronous>, transform_indices = @transform_20, window_bounds = array<i64: 256, 128>}, {pipeline_mode = #tpu.pipeline_mode<synchronous>, transform_indices = @transform_21, window_bounds = array<i64: 1, 128>}, {pipeline_mode = #tpu.pipeline_mode<synchronous>, transform_indices = @transform_22, window_bounds = array<i64: 128, 3>}, {pipeline_mode = #tpu.pipeline_mode<synchronous>, transform_indices = @transform_23, window_bounds = array<i64: 1, 3>}, {pipeline_mode = #tpu.pipeline_mode<synchronous>, transform_indices = @transform_24, window_bounds = array<i64: 2, 3>}]} {
    %c0_i32 = arith.constant 0 : i32
    %0 = arith.cmpi eq, %arg0, %c0_i32 : i32
    %1 = arith.extui %0 : i1 to i32
    %c0_i32_0 = arith.constant 0 : i32
    %2 = arith.cmpi ne, %1, %c0_i32_0 : i32
    scf.if %2 {
      %c0_75 = arith.constant 0 : index
      %c0_76 = arith.constant 0 : index
      %166 = vector.load %arg1[%c0_75, %c0_76] : memref<16x32xf32, #tpu.memory_space<vmem>>, vector<16x32xf32>
      %c0_77 = arith.constant 0 : index
      %c0_78 = arith.constant 0 : index
      %167 = vector.load %arg3[%c0_77, %c0_78] : memref<1x32xf32, #tpu.memory_space<vmem>>, vector<1x32xf32>
      %c0_79 = arith.constant 0 : index
      %c0_80 = arith.constant 0 : index
      %168 = vector.load %arg4[%c0_79, %c0_80] : memref<1x32xf32, #tpu.memory_space<vmem>>, vector<1x32xf32>
      %cst_81 = arith.constant dense<0.000000e+00> : vector<16xf32>
      %169 = vector.multi_reduction <add>, %166, %cst_81 [1] : vector<16x32xf32> to vector<16xf32>
      %170 = vector.shape_cast %169 : vector<16xf32> to vector<16x1xf32>
      %cst_82 = arith.constant 3.200000e+01 : f32
      %171 = vector.broadcast %cst_82 : f32 to vector<16x1xf32>
      %172 = arith.divf %170, %171 : vector<16x1xf32>
      %173 = vector.broadcast %172 : vector<16x1xf32> to vector<16x32xf32>
      %174 = arith.subf %166, %173 : vector<16x32xf32>
      %175 = arith.mulf %174, %174 : vector<16x32xf32>
      %cst_83 = arith.constant dense<0.000000e+00> : vector<16xf32>
      %176 = vector.multi_reduction <add>, %175, %cst_83 [1] : vector<16x32xf32> to vector<16xf32>
      %177 = vector.shape_cast %176 : vector<16xf32> to vector<16x1xf32>
      %cst_84 = arith.constant 3.200000e+01 : f32
      %178 = vector.broadcast %cst_84 : f32 to vector<16x1xf32>
      %179 = arith.divf %177, %178 : vector<16x1xf32>
      %180 = vector.broadcast %172 : vector<16x1xf32> to vector<16x32xf32>
      %181 = arith.subf %166, %180 : vector<16x32xf32>
      %cst_85 = arith.constant 9.99999996E-13 : f32
      %182 = vector.broadcast %cst_85 : f32 to vector<16x1xf32>
      %183 = arith.addf %179, %182 : vector<16x1xf32>
      %184 = math.rsqrt %183 : vector<16x1xf32>
      %185 = vector.broadcast %184 : vector<16x1xf32> to vector<16x32xf32>
      %186 = arith.mulf %181, %185 : vector<16x32xf32>
      %187 = vector.broadcast %167 : vector<1x32xf32> to vector<16x32xf32>
      %188 = arith.mulf %186, %187 : vector<16x32xf32>
      %189 = vector.broadcast %168 : vector<1x32xf32> to vector<16x32xf32>
      %190 = arith.addf %188, %189 : vector<16x32xf32>
      %c0_86 = arith.constant 0 : index
      %c0_87 = arith.constant 0 : index
      %191 = vector.load %arg26[%c0_86, %c0_87] : memref<16x32xf32, #tpu.memory_space<vmem>>, vector<16x32xf32>
      tpu.vector_store %arg26[%c0_86, %c0_87], %190 {strides = array<i32>} : memref<16x32xf32, #tpu.memory_space<vmem>>, vector<16x32xf32>,
    } else {
    }
    %c0 = arith.constant 0 : index
    %c0_1 = arith.constant 0 : index
    %3 = vector.load %arg26[%c0, %c0_1] : memref<16x32xf32, #tpu.memory_space<vmem>>, vector<16x32xf32>
    %4 = arith.truncf %3 : vector<16x32xf32> to vector<16x32xbf16>
    %c0_2 = arith.constant 0 : index
    %c0_3 = arith.constant 0 : index
    %c0_4 = arith.constant 0 : index
    %5 = vector.load %arg5[%c0_2, %c0_3, %c0_4] : memref<1x32x96xbf16, #tpu.memory_space<vmem>>, vector<1x32x96xbf16>
    %6 = vector.shape_cast %5 : vector<1x32x96xbf16> to vector<32x96xbf16>
    %cst = arith.constant dense<0.000000e+00> : vector<16x96xf32>
    %7 = tpu.matmul %4, %6, %cst {dimension_numbers = #tpu.dot_dimension_numbers<[1], [0], [0], [1], [0, 0, 1, 1], [], []>} : vector<16x32xbf16>, vector<32x96xbf16>, vector<16x96xf32> -> vector<16x96xf32>
    %c0_5 = arith.constant 0 : index
    %c0_6 = arith.constant 0 : index
    %c0_7 = arith.constant 0 : index
    %8 = vector.load %arg6[%c0_5, %c0_6, %c0_7] : memref<1x1x96xf32, #tpu.memory_space<vmem>>, vector<1x1x96xf32>
    %9 = vector.shape_cast %8 : vector<1x1x96xf32> to vector<1x96xf32>
    %10 = vector.broadcast %9 : vector<1x96xf32> to vector<16x96xf32>
    %11 = arith.addf %7, %10 : vector<16x96xf32>
    %c0_8 = arith.constant 0 : index
    %c0_9 = arith.constant 0 : index
    %12 = vector.load %arg2[%c0_8, %c0_9] : memref<2x8xf32, #tpu.memory_space<vmem>>, vector<2x8xf32>
    %13 = vector.shape_cast %12 : vector<2x8xf32> to vector<2x1x8xf32>
    %14 = vector.extract_strided_slice %11 {offsets = [0, 0], sizes = [16, 16], strides = [1, 1]} : vector<16x96xf32> to vector<16x16xf32>
    %15 = vector.shape_cast %14 : vector<16x16xf32> to vector<2x8x16xf32>
    %16 = arith.truncf %15 : vector<2x8x16xf32> to vector<2x8x16xbf16>
    %17 = vector.extract_strided_slice %11 {offsets = [0, 32], sizes = [16, 16], strides = [1, 1]} : vector<16x96xf32> to vector<16x16xf32>
    %18 = vector.shape_cast %17 : vector<16x16xf32> to vector<2x8x16xf32>
    %19 = arith.truncf %18 : vector<2x8x16xf32> to vector<2x8x16xbf16>
    %20 = vector.extract_strided_slice %11 {offsets = [0, 64], sizes = [16, 16], strides = [1, 1]} : vector<16x96xf32> to vector<16x16xf32>
    %21 = vector.shape_cast %20 : vector<16x16xf32> to vector<2x8x16xf32>
    %22 = arith.truncf %21 : vector<2x8x16xf32> to vector<2x8x16xbf16>
    "tpu.trace_start"() <{level = 10 : i32, message = "bqd,bkd->bqk"}> : () -> ()
    %cst_10 = arith.constant dense<0.000000e+00> : vector<2x8x8xf32>
    %23 = tpu.matmul %16, %19, %cst_10 {dimension_numbers = #tpu.dot_dimension_numbers<[2], [2], [1], [1], [0, 0, 0, 1, 1, 1], [0], [0]>} : vector<2x8x16xbf16>, vector<2x8x16xbf16>, vector<2x8x8xf32> -> vector<2x8x8xf32>
    "tpu.trace_stop"() : () -> ()
    %cst_11 = arith.constant 2.500000e-01 : f32
    %24 = vector.broadcast %cst_11 : f32 to vector<2x8x8xf32>
    %25 = arith.mulf %23, %24 : vector<2x8x8xf32>
    %26 = vector.broadcast %13 : vector<2x1x8xf32> to vector<2x8x8xf32>
    %27 = arith.addf %25, %26 : vector<2x8x8xf32>
    %cst_12 = arith.constant dense<0xFF800000> : vector<2x8xf32>
    %28 = vector.multi_reduction <maximumf>, %27, %cst_12 [2] : vector<2x8x8xf32> to vector<2x8xf32>
    %29 = vector.shape_cast %28 : vector<2x8xf32> to vector<2x8x1xf32>
    %30 = vector.broadcast %29 : vector<2x8x1xf32> to vector<2x8x8xf32>
    %31 = arith.subf %27, %30 : vector<2x8x8xf32>
    %32 = math.exp %31 : vector<2x8x8xf32>
    %cst_13 = arith.constant dense<0.000000e+00> : vector<2x8xf32>
    %33 = vector.multi_reduction <add>, %32, %cst_13 [2] : vector<2x8x8xf32> to vector<2x8xf32>
    %34 = vector.shape_cast %33 : vector<2x8xf32> to vector<2x8x1xf32>
    %35 = tpu.reciprocal %34 {approx = true} : vector<2x8x1xf32> -> vector<2x8x1xf32>
    %36 = vector.broadcast %35 : vector<2x8x1xf32> to vector<2x8x8xf32>
    %37 = arith.mulf %32, %36 : vector<2x8x8xf32>
    %38 = arith.truncf %37 : vector<2x8x8xf32> to vector<2x8x8xbf16>
    "tpu.trace_start"() <{level = 10 : i32, message = "bqk,bkd->bqd"}> : () -> ()
    %cst_14 = arith.constant dense<0.000000e+00> : vector<2x8x16xf32>
    %39 = tpu.matmul %38, %22, %cst_14 {dimension_numbers = #tpu.dot_dimension_numbers<[2], [1], [1], [2], [0, 0, 0, 1, 1, 2], [0], [0]>} : vector<2x8x8xbf16>, vector<2x8x16xbf16>, vector<2x8x16xf32> -> vector<2x8x16xf32>
    "tpu.trace_stop"() : () -> ()
    %40 = vector.shape_cast %39 : vector<2x8x16xf32> to vector<16x16xf32>
    %c0_15 = arith.constant 0 : index
    %c0_16 = arith.constant 0 : index
    %41 = vector.load %arg27[%c0_15, %c0_16] : memref<16x32xf32, #tpu.memory_space<vmem>>, vector<16x16xf32>
    tpu.vector_store %arg27[%c0_15, %c0_16], %40 {strides = array<i32>} : memref<16x32xf32, #tpu.memory_space<vmem>>, vector<16x16xf32>,
    %42 = vector.extract_strided_slice %11 {offsets = [0, 16], sizes = [16, 16], strides = [1, 1]} : vector<16x96xf32> to vector<16x16xf32>
    %43 = vector.shape_cast %42 : vector<16x16xf32> to vector<2x8x16xf32>
    %44 = arith.truncf %43 : vector<2x8x16xf32> to vector<2x8x16xbf16>
    %45 = vector.extract_strided_slice %11 {offsets = [0, 48], sizes = [16, 16], strides = [1, 1]} : vector<16x96xf32> to vector<16x16xf32>
    %46 = vector.shape_cast %45 : vector<16x16xf32> to vector<2x8x16xf32>
    %47 = arith.truncf %46 : vector<2x8x16xf32> to vector<2x8x16xbf16>
    %48 = vector.extract_strided_slice %11 {offsets = [0, 80], sizes = [16, 16], strides = [1, 1]} : vector<16x96xf32> to vector<16x16xf32>
    %49 = vector.shape_cast %48 : vector<16x16xf32> to vector<2x8x16xf32>
    %50 = arith.truncf %49 : vector<2x8x16xf32> to vector<2x8x16xbf16>
    "tpu.trace_start"() <{level = 10 : i32, message = "bqd,bkd->bqk"}> : () -> ()
    %cst_17 = arith.constant dense<0.000000e+00> : vector<2x8x8xf32>
    %51 = tpu.matmul %44, %47, %cst_17 {dimension_numbers = #tpu.dot_dimension_numbers<[2], [2], [1], [1], [0, 0, 0, 1, 1, 1], [0], [0]>} : vector<2x8x16xbf16>, vector<2x8x16xbf16>, vector<2x8x8xf32> -> vector<2x8x8xf32>
    "tpu.trace_stop"() : () -> ()
    %cst_18 = arith.constant 2.500000e-01 : f32
    %52 = vector.broadcast %cst_18 : f32 to vector<2x8x8xf32>
    %53 = arith.mulf %51, %52 : vector<2x8x8xf32>
    %54 = vector.broadcast %13 : vector<2x1x8xf32> to vector<2x8x8xf32>
    %55 = arith.addf %53, %54 : vector<2x8x8xf32>
    %cst_19 = arith.constant dense<0xFF800000> : vector<2x8xf32>
    %56 = vector.multi_reduction <maximumf>, %55, %cst_19 [2] : vector<2x8x8xf32> to vector<2x8xf32>
    %57 = vector.shape_cast %56 : vector<2x8xf32> to vector<2x8x1xf32>
    %58 = vector.broadcast %57 : vector<2x8x1xf32> to vector<2x8x8xf32>
    %59 = arith.subf %55, %58 : vector<2x8x8xf32>
    %60 = math.exp %59 : vector<2x8x8xf32>
    %cst_20 = arith.constant dense<0.000000e+00> : vector<2x8xf32>
    %61 = vector.multi_reduction <add>, %60, %cst_20 [2] : vector<2x8x8xf32> to vector<2x8xf32>
    %62 = vector.shape_cast %61 : vector<2x8xf32> to vector<2x8x1xf32>
    %63 = tpu.reciprocal %62 {approx = true} : vector<2x8x1xf32> -> vector<2x8x1xf32>
    %64 = vector.broadcast %63 : vector<2x8x1xf32> to vector<2x8x8xf32>
    %65 = arith.mulf %60, %64 : vector<2x8x8xf32>
    %66 = arith.truncf %65 : vector<2x8x8xf32> to vector<2x8x8xbf16>
    "tpu.trace_start"() <{level = 10 : i32, message = "bqk,bkd->bqd"}> : () -> ()
    %cst_21 = arith.constant dense<0.000000e+00> : vector<2x8x16xf32>
    %67 = tpu.matmul %66, %50, %cst_21 {dimension_numbers = #tpu.dot_dimension_numbers<[2], [1], [1], [2], [0, 0, 0, 1, 1, 2], [0], [0]>} : vector<2x8x8xbf16>, vector<2x8x16xbf16>, vector<2x8x16xf32> -> vector<2x8x16xf32>
    "tpu.trace_stop"() : () -> ()
    %68 = vector.shape_cast %67 : vector<2x8x16xf32> to vector<16x16xf32>
    %c0_22 = arith.constant 0 : index
    %c16 = arith.constant 16 : index
    %69 = vector.load %arg27[%c0_22, %c16] : memref<16x32xf32, #tpu.memory_space<vmem>>, vector<16x16xf32>
    tpu.vector_store %arg27[%c0_22, %c16], %68 {strides = array<i32>} : memref<16x32xf32, #tpu.memory_space<vmem>>, vector<16x16xf32>,
    %c0_23 = arith.constant 0 : index
    %c0_24 = arith.constant 0 : index
    %70 = vector.load %arg27[%c0_23, %c0_24] : memref<16x32xf32, #tpu.memory_space<vmem>>, vector<16x32xf32>
    %71 = arith.truncf %70 : vector<16x32xf32> to vector<16x32xbf16>
    %c0_25 = arith.constant 0 : index
    %c0_26 = arith.constant 0 : index
    %c0_27 = arith.constant 0 : index
    %72 = vector.load %arg7[%c0_25, %c0_26, %c0_27] : memref<1x32x32xbf16, #tpu.memory_space<vmem>>, vector<1x32x32xbf16>
    %73 = vector.shape_cast %72 : vector<1x32x32xbf16> to vector<32x32xbf16>
    %cst_28 = arith.constant dense<0.000000e+00> : vector<16x32xf32>
    %74 = tpu.matmul %71, %73, %cst_28 {dimension_numbers = #tpu.dot_dimension_numbers<[1], [0], [0], [1], [0, 0, 1, 1], [], []>} : vector<16x32xbf16>, vector<32x32xbf16>, vector<16x32xf32> -> vector<16x32xf32>
    %c0_29 = arith.constant 0 : index
    %c0_30 = arith.constant 0 : index
    %c0_31 = arith.constant 0 : index
    %75 = vector.load %arg8[%c0_29, %c0_30, %c0_31] : memref<1x1x32xf32, #tpu.memory_space<vmem>>, vector<1x1x32xf32>
    %76 = vector.shape_cast %75 : vector<1x1x32xf32> to vector<1x32xf32>
    %77 = vector.broadcast %76 : vector<1x32xf32> to vector<16x32xf32>
    %78 = arith.addf %74, %77 : vector<16x32xf32>
    %79 = arith.addf %78, %3 : vector<16x32xf32>
    %c0_32 = arith.constant 0 : index
    %c0_33 = arith.constant 0 : index
    %c0_34 = arith.constant 0 : index
    %80 = vector.load %arg9[%c0_32, %c0_33, %c0_34] : memref<1x1x32xf32, #tpu.memory_space<vmem>>, vector<1x1x32xf32>
    %81 = vector.shape_cast %80 : vector<1x1x32xf32> to vector<1x32xf32>
    %c0_35 = arith.constant 0 : index
    %c0_36 = arith.constant 0 : index
    %c0_37 = arith.constant 0 : index
    %82 = vector.load %arg10[%c0_35, %c0_36, %c0_37] : memref<1x1x32xf32, #tpu.memory_space<vmem>>, vector<1x1x32xf32>
    %83 = vector.shape_cast %82 : vector<1x1x32xf32> to vector<1x32xf32>
    %cst_38 = arith.constant dense<0.000000e+00> : vector<16xf32>
    %84 = vector.multi_reduction <add>, %79, %cst_38 [1] : vector<16x32xf32> to vector<16xf32>
    %85 = vector.shape_cast %84 : vector<16xf32> to vector<16x1xf32>
    %cst_39 = arith.constant 3.200000e+01 : f32
    %86 = vector.broadcast %cst_39 : f32 to vector<16x1xf32>
    %87 = arith.divf %85, %86 : vector<16x1xf32>
    %88 = vector.broadcast %87 : vector<16x1xf32> to vector<16x32xf32>
    %89 = arith.subf %79, %88 : vector<16x32xf32>
    %90 = arith.mulf %89, %89 : vector<16x32xf32>
    %cst_40 = arith.constant dense<0.000000e+00> : vector<16xf32>
    %91 = vector.multi_reduction <add>, %90, %cst_40 [1] : vector<16x32xf32> to vector<16xf32>
    %92 = vector.shape_cast %91 : vector<16xf32> to vector<16x1xf32>
    %cst_41 = arith.constant 3.200000e+01 : f32
    %93 = vector.broadcast %cst_41 : f32 to vector<16x1xf32>
    %94 = arith.divf %92, %93 : vector<16x1xf32>
    %95 = vector.broadcast %87 : vector<16x1xf32> to vector<16x32xf32>
    %96 = arith.subf %79, %95 : vector<16x32xf32>
    %cst_42 = arith.constant 9.99999996E-13 : f32
    %97 = vector.broadcast %cst_42 : f32 to vector<16x1xf32>
    %98 = arith.addf %94, %97 : vector<16x1xf32>
    %99 = math.rsqrt %98 : vector<16x1xf32>
    %100 = vector.broadcast %99 : vector<16x1xf32> to vector<16x32xf32>
    %101 = arith.mulf %96, %100 : vector<16x32xf32>
    %102 = vector.broadcast %81 : vector<1x32xf32> to vector<16x32xf32>
    %103 = arith.mulf %101, %102 : vector<16x32xf32>
    %104 = vector.broadcast %83 : vector<1x32xf32> to vector<16x32xf32>
    %105 = arith.addf %103, %104 : vector<16x32xf32>
    %106 = arith.truncf %105 : vector<16x32xf32> to vector<16x32xbf16>
    %c0_43 = arith.constant 0 : index
    %c0_44 = arith.constant 0 : index
    %c0_45 = arith.constant 0 : index
    %107 = vector.load %arg11[%c0_43, %c0_44, %c0_45] : memref<1x32x64xbf16, #tpu.memory_space<vmem>>, vector<1x32x64xbf16>
    %108 = vector.shape_cast %107 : vector<1x32x64xbf16> to vector<32x64xbf16>
    %cst_46 = arith.constant dense<0.000000e+00> : vector<16x64xf32>
    %109 = tpu.matmul %106, %108, %cst_46 {dimension_numbers = #tpu.dot_dimension_numbers<[1], [0], [0], [1], [0, 0, 1, 1], [], []>} : vector<16x32xbf16>, vector<32x64xbf16>, vector<16x64xf32> -> vector<16x64xf32>
    %c0_47 = arith.constant 0 : index
    %c0_48 = arith.constant 0 : index
    %c0_49 = arith.constant 0 : index
    %110 = vector.load %arg12[%c0_47, %c0_48, %c0_49] : memref<1x1x64xf32, #tpu.memory_space<vmem>>, vector<1x1x64xf32>
    %111 = vector.shape_cast %110 : vector<1x1x64xf32> to vector<1x64xf32>
    %112 = vector.broadcast %111 : vector<1x64xf32> to vector<16x64xf32>
    %113 = arith.addf %109, %112 : vector<16x64xf32>
    %cst_50 = arith.constant 5.000000e-01 : f32
    %114 = vector.broadcast %cst_50 : f32 to vector<16x64xf32>
    %115 = arith.mulf %114, %113 : vector<16x64xf32>
    %cst_51 = arith.constant 4.471500e-02 : f32
    %116 = vector.broadcast %cst_51 : f32 to vector<16x64xf32>
    %117 = arith.mulf %116, %113 : vector<16x64xf32>
    %118 = arith.mulf %117, %113 : vector<16x64xf32>
    %119 = arith.mulf %118, %113 : vector<16x64xf32>
    %120 = arith.addf %113, %119 : vector<16x64xf32>
    %cst_52 = arith.constant 0.797884583 : f32
    %121 = vector.broadcast %cst_52 : f32 to vector<16x64xf32>
    %122 = arith.mulf %121, %120 : vector<16x64xf32>
    %123 = math.tanh %122 : vector<16x64xf32>
    %cst_53 = arith.constant 1.000000e+00 : f32
    %124 = vector.broadcast %cst_53 : f32 to vector<16x64xf32>
    %125 = arith.addf %124, %123 : vector<16x64xf32>
    %126 = arith.mulf %115, %125 : vector<16x64xf32>
    %127 = arith.truncf %126 : vector<16x64xf32> to vector<16x64xbf16>
    %c0_54 = arith.constant 0 : index
    %c0_55 = arith.constant 0 : index
    %c0_56 = arith.constant 0 : index
    %128 = vector.load %arg13[%c0_54, %c0_55, %c0_56] : memref<1x64x32xbf16, #tpu.memory_space<vmem>>, vector<1x64x32xbf16>
    %129 = vector.shape_cast %128 : vector<1x64x32xbf16> to vector<64x32xbf16>
    %cst_57 = arith.constant dense<0.000000e+00> : vector<16x32xf32>
    %130 = tpu.matmul %127, %129, %cst_57 {dimension_numbers = #tpu.dot_dimension_numbers<[1], [0], [0], [1], [0, 0, 1, 1], [], []>} : vector<16x64xbf16>, vector<64x32xbf16>, vector<16x32xf32> -> vector<16x32xf32>
    %c0_58 = arith.constant 0 : index
    %c0_59 = arith.constant 0 : index
    %c0_60 = arith.constant 0 : index
    %131 = vector.load %arg14[%c0_58, %c0_59, %c0_60] : memref<1x1x32xf32, #tpu.memory_space<vmem>>, vector<1x1x32xf32>
    %132 = vector.shape_cast %131 : vector<1x1x32xf32> to vector<1x32xf32>
    %133 = vector.broadcast %132 : vector<1x32xf32> to vector<16x32xf32>
    %134 = arith.addf %130, %133 : vector<16x32xf32>
    %135 = arith.addf %134, %105 : vector<16x32xf32>
    %c0_61 = arith.constant 0 : index
    %c0_62 = arith.constant 0 : index
    %c0_63 = arith.constant 0 : index
    %136 = vector.load %arg15[%c0_61, %c0_62, %c0_63] : memref<1x1x32xf32, #tpu.memory_space<vmem>>, vector<1x1x32xf32>
    %137 = vector.shape_cast %136 : vector<1x1x32xf32> to vector<1x32xf32>
    %c0_64 = arith.constant 0 : index
    %c0_65 = arith.constant 0 : index
    %c0_66 = arith.constant 0 : index
    %138 = vector.load %arg16[%c0_64, %c0_65, %c0_66] : memref<1x1x32xf32, #tpu.memory_space<vmem>>, vector<1x1x32xf32>
    %139 = vector.shape_cast %138 : vector<1x1x32xf32> to vector<1x32xf32>
    %cst_67 = arith.constant dense<0.000000e+00> : vector<16xf32>
    %140 = vector.multi_reduction <add>, %135, %cst_67 [1] : vector<16x32xf32> to vector<16xf32>
    %141 = vector.shape_cast %140 : vector<16xf32> to vector<16x1xf32>
    %cst_68 = arith.constant 3.200000e+01 : f32
    %142 = vector.broadcast %cst_68 : f32 to vector<16x1xf32>
    %143 = arith.divf %141, %142 : vector<16x1xf32>
    %144 = vector.broadcast %143 : vector<16x1xf32> to vector<16x32xf32>
    %145 = arith.subf %135, %144 : vector<16x32xf32>
    %146 = arith.mulf %145, %145 : vector<16x32xf32>
    %cst_69 = arith.constant dense<0.000000e+00> : vector<16xf32>
    %147 = vector.multi_reduction <add>, %146, %cst_69 [1] : vector<16x32xf32> to vector<16xf32>
    %148 = vector.shape_cast %147 : vector<16xf32> to vector<16x1xf32>
    %cst_70 = arith.constant 3.200000e+01 : f32
    %149 = vector.broadcast %cst_70 : f32 to vector<16x1xf32>
    %150 = arith.divf %148, %149 : vector<16x1xf32>
    %151 = vector.broadcast %143 : vector<16x1xf32> to vector<16x32xf32>
    %152 = arith.subf %135, %151 : vector<16x32xf32>
    %cst_71 = arith.constant 9.99999996E-13 : f32
    %153 = vector.broadcast %cst_71 : f32 to vector<16x1xf32>
    %154 = arith.addf %150, %153 : vector<16x1xf32>
    %155 = math.rsqrt %154 : vector<16x1xf32>
    %156 = vector.broadcast %155 : vector<16x1xf32> to vector<16x32xf32>
    %157 = arith.mulf %152, %156 : vector<16x32xf32>
    %158 = vector.broadcast %137 : vector<1x32xf32> to vector<16x32xf32>
    %159 = arith.mulf %157, %158 : vector<16x32xf32>
    %160 = vector.broadcast %139 : vector<1x32xf32> to vector<16x32xf32>
    %161 = arith.addf %159, %160 : vector<16x32xf32>
    %c0_72 = arith.constant 0 : index
    %c0_73 = arith.constant 0 : index
    %162 = vector.load %arg26[%c0_72, %c0_73] : memref<16x32xf32, #tpu.memory_space<vmem>>, vector<16x32xf32>
    tpu.vector_store %arg26[%c0_72, %c0_73], %161 {strides = array<i32>} : memref<16x32xf32, #tpu.memory_space<vmem>>, vector<16x32xf32>,
    %c1_i32 = arith.constant 1 : i32
    %163 = arith.cmpi eq, %arg0, %c1_i32 : i32
    %164 = arith.extui %163 : i1 to i32
    %c0_i32_74 = arith.constant 0 : i32
    %165 = arith.cmpi ne, %164, %c0_i32_74 : i32
    scf.if %165 {
      %166 = vector.extract_strided_slice %161 {offsets = [0, 0], sizes = [1, 32], strides = [1, 1]} : vector<16x32xf32> to vector<1x32xf32>
      %167 = vector.extract_strided_slice %161 {offsets = [8, 0], sizes = [1, 32], strides = [1, 1]} : vector<16x32xf32> to vector<1x32xf32>
      %168 = tpu.concatenate %166, %167 in 0 : vector<1x32xf32>, vector<1x32xf32> -> vector<2x32xf32>
      %169 = arith.truncf %168 : vector<2x32xf32> to vector<2x32xbf16>
      %c0_75 = arith.constant 0 : index
      %c0_76 = arith.constant 0 : index
      %170 = vector.load %arg17[%c0_75, %c0_76] : memref<32x32xbf16, #tpu.memory_space<vmem>>, vector<32x32xbf16>
      %cst_77 = arith.constant dense<0.000000e+00> : vector<2x32xf32>
      %171 = tpu.matmul %169, %170, %cst_77 {dimension_numbers = #tpu.dot_dimension_numbers<[1], [0], [0], [1], [0, 0, 1, 1], [], []>} : vector<2x32xbf16>, vector<32x32xbf16>, vector<2x32xf32> -> vector<2x32xf32>
      %c0_78 = arith.constant 0 : index
      %c0_79 = arith.constant 0 : index
      %172 = vector.load %arg18[%c0_78, %c0_79] : memref<1x32xf32, #tpu.memory_space<vmem>>, vector<1x32xf32>
      %173 = vector.broadcast %172 : vector<1x32xf32> to vector<2x32xf32>
      %174 = arith.addf %171, %173 : vector<2x32xf32>
      %175 = math.tanh %174 : vector<2x32xf32>
      %176 = arith.truncf %175 : vector<2x32xf32> to vector<2x32xbf16>
      %c0_80 = arith.constant 0 : index
      %c0_81 = arith.constant 0 : index
      %177 = vector.load %arg19[%c0_80, %c0_81] : memref<32x256xbf16, #tpu.memory_space<vmem>>, vector<32x256xbf16>
      %cst_82 = arith.constant dense<0.000000e+00> : vector<2x256xf32>
      %178 = tpu.matmul %176, %177, %cst_82 {dimension_numbers = #tpu.dot_dimension_numbers<[1], [0], [0], [1], [0, 0, 1, 1], [], []>} : vector<2x32xbf16>, vector<32x256xbf16>, vector<2x256xf32> -> vector<2x256xf32>
      %c0_83 = arith.constant 0 : index
      %c0_84 = arith.constant 0 : index
      %179 = vector.load %arg20[%c0_83, %c0_84] : memref<1x256xf32, #tpu.memory_space<vmem>>, vector<1x256xf32>
      %180 = vector.broadcast %179 : vector<1x256xf32> to vector<2x256xf32>
      %181 = arith.addf %178, %180 : vector<2x256xf32>
      %cst_85 = arith.constant 0.000000e+00 : f32
      %182 = vector.broadcast %cst_85 : f32 to vector<2x256xf32>
      %183 = arith.maximumf %181, %182 : vector<2x256xf32>
      %184 = arith.truncf %183 : vector<2x256xf32> to vector<2x256xbf16>
      %c0_86 = arith.constant 0 : index
      %c0_87 = arith.constant 0 : index
      %185 = vector.load %arg21[%c0_86, %c0_87] : memref<256x128xbf16, #tpu.memory_space<vmem>>, vector<256x128xbf16>
      %cst_88 = arith.constant dense<0.000000e+00> : vector<2x128xf32>
      %186 = tpu.matmul %184, %185, %cst_88 {dimension_numbers = #tpu.dot_dimension_numbers<[1], [0], [0], [1], [0, 0, 1, 1], [], []>} : vector<2x256xbf16>, vector<256x128xbf16>, vector<2x128xf32> -> vector<2x128xf32>
      %c0_89 = arith.constant 0 : index
      %c0_90 = arith.constant 0 : index
      %187 = vector.load %arg22[%c0_89, %c0_90] : memref<1x128xf32, #tpu.memory_space<vmem>>, vector<1x128xf32>
      %188 = vector.broadcast %187 : vector<1x128xf32> to vector<2x128xf32>
      %189 = arith.addf %186, %188 : vector<2x128xf32>
      %cst_91 = arith.constant 0.000000e+00 : f32
      %190 = vector.broadcast %cst_91 : f32 to vector<2x128xf32>
      %191 = arith.maximumf %189, %190 : vector<2x128xf32>
      %192 = arith.truncf %191 : vector<2x128xf32> to vector<2x128xbf16>
      %c0_92 = arith.constant 0 : index
      %c0_93 = arith.constant 0 : index
      %193 = vector.load %arg23[%c0_92, %c0_93] : memref<128x3xbf16, #tpu.memory_space<vmem>>, vector<128x3xbf16>
      %cst_94 = arith.constant dense<0.000000e+00> : vector<2x3xf32>
      %194 = tpu.matmul %192, %193, %cst_94 {dimension_numbers = #tpu.dot_dimension_numbers<[1], [0], [0], [1], [0, 0, 1, 1], [], []>} : vector<2x128xbf16>, vector<128x3xbf16>, vector<2x3xf32> -> vector<2x3xf32>
      %c0_95 = arith.constant 0 : index
      %c0_96 = arith.constant 0 : index
      %195 = vector.load %arg24[%c0_95, %c0_96] : memref<1x3xf32, #tpu.memory_space<vmem>>, vector<1x3xf32>
      %196 = vector.broadcast %195 : vector<1x3xf32> to vector<2x3xf32>
      %197 = arith.addf %194, %196 : vector<2x3xf32>
      %c0_97 = arith.constant 0 : index
      %c0_98 = arith.constant 0 : index
      %198 = vector.load %arg25[%c0_97, %c0_98] : memref<2x3xf32, #tpu.memory_space<vmem>>, vector<2x3xf32>
      tpu.vector_store %arg25[%c0_97, %c0_98], %197 {strides = array<i32>} : memref<2x3xf32, #tpu.memory_space<vmem>>, vector<2x3xf32>,
    } else {
    }
    return
  }
  func.func @transform_0(%arg0: i32) -> (i32, i32) {
    %c0_i32 = arith.constant 0 : i32
    %c0_i32_0 = arith.constant 0 : i32
    %c0_i32_1 = arith.constant 0 : i32
    return %c0_i32, %c0_i32_0 : i32, i32
  }
  func.func @transform_1(%arg0: i32) -> (i32, i32) {
    %c0_i32 = arith.constant 0 : i32
    %c0_i32_0 = arith.constant 0 : i32
    %c0_i32_1 = arith.constant 0 : i32
    return %c0_i32, %c0_i32_0 : i32, i32
  }
  func.func @transform_2(%arg0: i32) -> (i32, i32) {
    %c0_i32 = arith.constant 0 : i32
    %c0_i32_0 = arith.constant 0 : i32
    %c0_i32_1 = arith.constant 0 : i32
    return %c0_i32, %c0_i32_0 : i32, i32
  }
  func.func @transform_3(%arg0: i32) -> (i32, i32) {
    %c0_i32 = arith.constant 0 : i32
    %c0_i32_0 = arith.constant 0 : i32
    %c0_i32_1 = arith.constant 0 : i32
    return %c0_i32, %c0_i32_0 : i32, i32
  }
  func.func @transform_4(%arg0: i32) -> (i32, i32, i32) {
    %c0_i32 = arith.constant 0 : i32
    %c0_i32_0 = arith.constant 0 : i32
    %c0_i32_1 = arith.constant 0 : i32
    return %arg0, %c0_i32, %c0_i32_0 : i32, i32, i32
  }
  func.func @transform_5(%arg0: i32) -> (i32, i32, i32) {
    %c0_i32 = arith.constant 0 : i32
    %c0_i32_0 = arith.constant 0 : i32
    %c0_i32_1 = arith.constant 0 : i32
    return %arg0, %c0_i32, %c0_i32_0 : i32, i32, i32
  }
  func.func @transform_6(%arg0: i32) -> (i32, i32, i32) {
    %c0_i32 = arith.constant 0 : i32
    %c0_i32_0 = arith.constant 0 : i32
    %c0_i32_1 = arith.constant 0 : i32
    return %arg0, %c0_i32, %c0_i32_0 : i32, i32, i32
  }
  func.func @transform_7(%arg0: i32) -> (i32, i32, i32) {
    %c0_i32 = arith.constant 0 : i32
    %c0_i32_0 = arith.constant 0 : i32
    %c0_i32_1 = arith.constant 0 : i32
    return %arg0, %c0_i32, %c0_i32_0 : i32, i32, i32
  }
  func.func @transform_8(%arg0: i32) -> (i32, i32, i32) {
    %c0_i32 = arith.constant 0 : i32
    %c0_i32_0 = arith.constant 0 : i32
    %c0_i32_1 = arith.constant 0 : i32
    return %arg0, %c0_i32, %c0_i32_0 : i32, i32, i32
  }
  func.func @transform_9(%arg0: i32) -> (i32, i32, i32) {
    %c0_i32 = arith.constant 0 : i32
    %c0_i32_0 = arith.constant 0 : i32
    %c0_i32_1 = arith.constant 0 : i32
    return %arg0, %c0_i32, %c0_i32_0 : i32, i32, i32
  }
  func.func @transform_10(%arg0: i32) -> (i32, i32, i32) {
    %c0_i32 = arith.constant 0 : i32
    %c0_i32_0 = arith.constant 0 : i32
    %c0_i32_1 = arith.constant 0 : i32
    return %arg0, %c0_i32, %c0_i32_0 : i32, i32, i32
  }
  func.func @transform_11(%arg0: i32) -> (i32, i32, i32) {
    %c0_i32 = arith.constant 0 : i32
    %c0_i32_0 = arith.constant 0 : i32
    %c0_i32_1 = arith.constant 0 : i32
    return %arg0, %c0_i32, %c0_i32_0 : i32, i32, i32
  }
  func.func @transform_12(%arg0: i32) -> (i32, i32, i32) {
    %c0_i32 = arith.constant 0 : i32
    %c0_i32_0 = arith.constant 0 : i32
    %c0_i32_1 = arith.constant 0 : i32
    return %arg0, %c0_i32, %c0_i32_0 : i32, i32, i32
  }
  func.func @transform_13(%arg0: i32) -> (i32, i32, i32) {
    %c0_i32 = arith.constant 0 : i32
    %c0_i32_0 = arith.constant 0 : i32
    %c0_i32_1 = arith.constant 0 : i32
    return %arg0, %c0_i32, %c0_i32_0 : i32, i32, i32
  }
  func.func @transform_14(%arg0: i32) -> (i32, i32, i32) {
    %c0_i32 = arith.constant 0 : i32
    %c0_i32_0 = arith.constant 0 : i32
    %c0_i32_1 = arith.constant 0 : i32
    return %arg0, %c0_i32, %c0_i32_0 : i32, i32, i32
  }
  func.func @transform_15(%arg0: i32) -> (i32, i32, i32) {
    %c0_i32 = arith.constant 0 : i32
    %c0_i32_0 = arith.constant 0 : i32
    %c0_i32_1 = arith.constant 0 : i32
    return %arg0, %c0_i32, %c0_i32_0 : i32, i32, i32
  }
  func.func @transform_16(%arg0: i32) -> (i32, i32) {
    %c0_i32 = arith.constant 0 : i32
    %c0_i32_0 = arith.constant 0 : i32
    %c0_i32_1 = arith.constant 0 : i32
    return %c0_i32, %c0_i32_0 : i32, i32
  }
  func.func @transform_17(%arg0: i32) -> (i32, i32) {
    %c0_i32 = arith.constant 0 : i32
    %c0_i32_0 = arith.constant 0 : i32
    %c0_i32_1 = arith.constant 0 : i32
    return %c0_i32, %c0_i32_0 : i32, i32
  }
  func.func @transform_18(%arg0: i32) -> (i32, i32) {
    %c0_i32 = arith.constant 0 : i32
    %c0_i32_0 = arith.constant 0 : i32
    %c0_i32_1 = arith.constant 0 : i32
    return %c0_i32, %c0_i32_0 : i32, i32
  }
  func.func @transform_19(%arg0: i32) -> (i32, i32) {
    %c0_i32 = arith.constant 0 : i32
    %c0_i32_0 = arith.constant 0 : i32
    %c0_i32_1 = arith.constant 0 : i32
    return %c0_i32, %c0_i32_0 : i32, i32
  }
  func.func @transform_20(%arg0: i32) -> (i32, i32) {
    %c0_i32 = arith.constant 0 : i32
    %c0_i32_0 = arith.constant 0 : i32
    %c0_i32_1 = arith.constant 0 : i32
    return %c0_i32, %c0_i32_0 : i32, i32
  }
  func.func @transform_21(%arg0: i32) -> (i32, i32) {
    %c0_i32 = arith.constant 0 : i32
    %c0_i32_0 = arith.constant 0 : i32
    %c0_i32_1 = arith.constant 0 : i32
    return %c0_i32, %c0_i32_0 : i32, i32
  }
  func.func @transform_22(%arg0: i32) -> (i32, i32) {
    %c0_i32 = arith.constant 0 : i32
    %c0_i32_0 = arith.constant 0 : i32
    %c0_i32_1 = arith.constant 0 : i32
    return %c0_i32, %c0_i32_0 : i32, i32
  }
  func.func @transform_23(%arg0: i32) -> (i32, i32) {
    %c0_i32 = arith.constant 0 : i32
    %c0_i32_0 = arith.constant 0 : i32
    %c0_i32_1 = arith.constant 0 : i32
    return %c0_i32, %c0_i32_0 : i32, i32
  }
  func.func @transform_24(%arg0: i32) -> (i32, i32) {
    %c0_i32 = arith.constant 0 : i32
    %c0_i32_0 = arith.constant 0 : i32
    %c0_i32_1 = arith.constant 0 : i32
    return %c0_i32, %c0_i32_0 : i32, i32
  }
}

</mosaic_0001>

<bundles_post_ra>
// kernel: bert_classifier_forward.1
= control target key start
LH: loop header
LB: loop body
LE: loop exit
PB: predicated region body
PF: predicated region fallthrough
CT: control target
= control target key end

     0   :  { %s3402_s0 = inlined_call_operand.vmem [shape: f32[16,32], index: 0, kind: input, shape index: {}]   ;;  %s3403_s1 = inlined_call_operand.vmem [shape: f32[2,8], index: 1, kind: input, shape index: {}]   ;;  %s3404_s2 = inlined_call_operand.vmem [shape: f32[1,32], index: 2, kind: input, shape index: {}]   ;;  %s3405_s3 = inlined_call_operand.vmem [shape: f32[1,32], index: 3, kind: input, shape index: {}]   ;;  %s3406_s4 = inlined_call_operand.vmem [shape: bf16[2,32,96], index: 4, kind: input, shape index: {}]   ;;  %s3407_s5 = inlined_call_operand.vmem [shape: f32[2,1,96], index: 5, kind: input, shape index: {}]   ;;  %s3408_s6 = inlined_call_operand.vmem [shape: bf16[2,32,32], index: 6, kind: input, shape index: {}]   ;;  %s3409_s7 = inlined_call_operand.vmem [shape: f32[2,1,32], index: 7, kind: input, shape index: {}]   ;;  %s3410_s8 = inlined_call_operand.vmem [shape: f32[2,1,32], index: 8, kind: input, shape index: {}]   ;;  %s3411_s9 = inlined_call_operand.vmem [shape: f32[2,1,32], index: 9, kind: input, shape index: {}]   ;;  %s3412_s10 = inlined_call_operand.vmem [shape: bf16[2,32,64], index: 10, kind: input, shape index: {}]   ;;  %s3413_s11 = inlined_call_operand.vmem [shape: f32[2,1,64], index: 11, kind: input, shape index: {}]   ;;  %s3414_s12 = inlined_call_operand.vmem [shape: bf16[2,64,32], index: 12, kind: input, shape index: {}]   ;;  %s3415_s13 = inlined_call_operand.vmem [shape: f32[2,1,32], index: 13, kind: input, shape index: {}]   ;;  %s3416_s14 = inlined_call_operand.vmem [shape: f32[2,1,32], index: 14, kind: input, shape index: {}]   ;;  %s3417_s15 = inlined_call_operand.vmem [shape: f32[2,1,32], index: 15, kind: input, shape index: {}]   ;;  %s3418_s16 = inlined_call_operand.vmem [shape: bf16[32,32], index: 16, kind: input, shape index: {}]   ;;  %s3419_s17 = inlined_call_operand.vmem [shape: f32[1,32], index: 17, kind: input, shape index: {}]   ;;  %s3420_s18 = inlined_call_operand.vmem [shape: bf16[32,256], index: 18, kind: input, shape index: {}]   ;;  %s3421_s19 = inlined_call_operand.vmem [shape: f32[1,256], index: 19, kind: input, shape index: {}]   ;;  %s3422_s20 = inlined_call_operand.vmem [shape: bf16[256,128], index: 20, kind: input, shape index: {}]   ;;  %s3423_s21 = inlined_call_operand.vmem [shape: f32[1,128], index: 21, kind: input, shape index: {}]   ;;  %s3424_s22 = inlined_call_operand.vmem [shape: bf16[128,3], index: 22, kind: input, shape index: {}]   ;;  %s3425_s23 = inlined_call_operand.vmem [shape: f32[1,3], index: 23, kind: input, shape index: {}]   ;;  %s3426_s24 = inlined_call_operand.hbm [shape: f32[2,3], index: 24, kind: output, shape index: {}]  }
   0x1   :  { %3432 = sst [smem:[#allocation8_spill]] %s3402_s0 }
   0x2   :  { %3433 = sst [smem:[#allocation9_spill]] %s3403_s1 }
   0x3   :  { %3434 = sst [smem:[#allocation10_spill]] %s3404_s2 }
   0x4   :  { %3435 = sst [smem:[#allocation11_spill]] %s3405_s3 }
   0x5   :  { %3436 = sst [smem:[#allocation12_spill]] %s3406_s4 }
   0x6   :  { %3437 = sst [smem:[#allocation13_spill]] %s3407_s5 }
   0x7   :  { %3438 = sst [smem:[#allocation14_spill]] %s3408_s6 }
   0x8   :  { %3439 = sst [smem:[#allocation15_spill]] %s3409_s7 }
   0x9   :  { %3440 = sst [smem:[#allocation16_spill]] %s3410_s8 }
   0xa   :  { %3441 = sst [smem:[#allocation17_spill]] %s3419_s17 }
   0xb   :  { %3442 = sst [smem:[#allocation18_spill]] %s3420_s18 }
   0xc   :  { %3443 = sst [smem:[#allocation19_spill]] %s3421_s19 }
   0xd   :  { %3444 = sst [smem:[#allocation20_spill]] %s3422_s20 }
   0xe   :  { %3445 = sst [smem:[#allocation21_spill]] %s3423_s21 }
   0xf   :  { %3446 = sst [smem:[#allocation22_spill]] %s3424_s22 }
  0x10   :  { %3447 = sst [smem:[#allocation23_spill]] %s3425_s23 }
  0x11   :  { %3448 = sst [smem:[#allocation24_spill]] %s3426_s24 }
  0x12   :  { %29 = vsyncpa [#allocation5], 0  ;;  %s3005_s5 = smov 0  }
  0x13 LB: > { %3449 = sst [smem:[#allocation7_spill]] %s2865_s5  ;;  %s3011_s26 = sadd.s32 4294967295, %s2865_s5   ;;  %s2865_s5 = sphi %s3005_s5, %s35_s5  }
  0x14   : > { %p2465_p0 = scmp.ge.s32.totalorder %s2865_s5, 1  ;;  %p752_p1 = scmp.lt.s32.totalorder %s2865_s5, 3 }
  0x16   : > { %p753_p2 = pnand %p2465_p0, %p752_p1 }
  0x17   : > { %p852_p3 = scmp.lt.s32.totalorder (!%p753_p2), %s3011_s26, 1  ;;  %s3451_s3 = sld [smem:[#allocation12_spill]] (!%p753_p2) }
  0x18   : > { %756 = sbr.rel (%p753_p2) target bundleno = 4132 (0x1024), region = 116  ;;  %s3452_s1 = sld [smem:[#allocation14_spill]] (!%p753_p2) }
  0x19   : > { %s3453_s21 = sld [smem:[#allocation15_spill]] (!%p753_p2)  ;;  %p2474_p4 = scmp.ne.s32.totalorder (!%p753_p2), %s3011_s26, 0 }
  0x1a   : > { %s3454_s20 = sld [smem:[#allocation16_spill]] (!%p753_p2) }
  0x1d   : > { %s3017_s27 = scalar_select %p852_p3, %s3011_s26, 1 }
  0x1e   : > { %s3455_s23 = sld [smem:[#allocation8_spill]] (!%p2474_p4) }
  0x1f   : > { %s2548_s28 = sshll.u32 %s3017_s27, 4  ;;  %s867_s19 = scalar_lea.vmem %s3453_s21, %s3017_s27 }
  0x20   : > { %s3027_s25 = scalar_lea.vmem %s3451_s3, %s2548_s28  ;;  %s3032_s5 = scalar_lea.vmem %s3452_s1, %s2548_s28 }
  0x21   : > { %s870_s18 = scalar_lea.vmem %s3454_s20, %s3017_s27  ;;  %s3049_s3 = scalar_lea.vmem %s3412_s10, %s2548_s28 }
  0x22   : > { %s881_s1 = scalar_lea.vmem %s3413_s11, %s3017_s27  ;;  %s2551_s0 = sshll.u32 %s3017_s27, 5 }
  0x23   : > { %s3059_s24 = scalar_lea.vmem %s3414_s12, %s2551_s0  ;;  %s889_s22 = scalar_lea.vmem %s3415_s13, %s3017_s27 }
  0x24   : > { %s892_s7 = scalar_lea.vmem %s3416_s14, %s3017_s27  ;;  %s895_s29 = scalar_lea.vmem %s3417_s15, %s3017_s27 }
  0x25   : > { %900 = sbr.rel (%p2474_p4) target bundleno = 356 (0x164), region = 120  ;;  %s3456_s6 = sld [smem:[#allocation10_spill]] (!%p2474_p4) }
  0x26   : > { %s3457_s30 = sld [smem:[#allocation11_spill]] (!%p2474_p4) }
  0x2a   : > { %v901_v0 = vld [vmem:[%s3455_s23] sm:$0xff]  ;;  %vm905_vm0 = vcmask 261120   ;;  %v902_v1 = vld [vmem:[%s3455_s23 + $0x8] sm:$0xff] }
  0x2b   : > { %v906_v2 = vsel %vm905_vm0, %v901_v0, 0.0  ;;  %v909_v3 = vsel %vm905_vm0, %v902_v1, 0.0  ;;  %v2475_v21 = vld [vmem:[%s3456_s6] ss:$0 sm:$0xff] }
  0x2c   : > { %907 = vadd.xlane.f32.xlu0 %v906_v2  ;;  %v2476_v23 = vld [vmem:[%s3457_s30] ss:$0 sm:$0xff] }
  0x30   : > { %910 = vadd.xlane.f32.xlu0 %v909_v3 }
  0xb5   : > { %v908_v4 = vpop.xlane.xlu0 %907 }
  0xb6   : > { %v913_v5 = vmul.f32 0.03125, %v908_v4 }
  0xb8   : > { %v915_v6 = vsub.f32 %v901_v0, %v913_v5 }
  0xb9   : > { %v911_v7 = vpop.xlane.xlu0 %910 }
  0xba   : > { %v914_v8 = vmul.f32 0.03125, %v911_v7  ;;  %v917_v9 = vmul.f32 %v915_v6, %v915_v6 }
  0xbc   : > { %v916_v10 = vsub.f32 %v902_v1, %v914_v8  ;;  %v919_v11 = vsel %vm905_vm0, %v917_v9, 0.0 }
  0xbd   : > { %920 = vadd.xlane.f32.xlu1 %v919_v11 }
  0xbe   : > { %v918_v12 = vmul.f32 %v916_v10, %v916_v10 }
  0xc0   : > { %v922_v13 = vsel %vm905_vm0, %v918_v12, 0.0 }
  0xc1   : > { %923 = vadd.xlane.f32.xlu1 %v922_v13 }
 0x146   : > { %v921_v14 = vpop.xlane.xlu1 %920 }
 0x147   : > { %v925_v15 = vmul.f32 0.03125, %v921_v14 }
 0x149   : > { %v927_v16 = vadd.f32 1e-12, %v925_v15 }
 0x14a   : > { %v924_v17 = vpop.xlane.xlu1 %923 }
 0x14b   : > { %2755 = vrsqrt.f32 %v927_v16  ;;  %v926_v18 = vmul.f32 0.03125, %v924_v17 }
 0x14d   : > { %v928_v19 = vadd.f32 1e-12, %v926_v18 }
 0x14f   : > { %2757 = vrsqrt.f32 %v928_v19 }
 0x158   : > { %v2756_v20 = vpop.eup %2755 }
 0x159   : > { %v931_v22 = vmul.f32 %v2756_v20, %v915_v6 }
 0x15b   : > { %v939_v24 = vmul.f32 %v2475_v21, %v931_v22 }
 0x15c   : > { %v2758_v25 = vpop.eup %2757 }
 0x15d   : > { %v947_v26 = vadd.f32 %v2476_v23, %v939_v24  ;;  %v932_v27 = vmul.f32 %v2758_v25, %v916_v10 }
 0x15f   : > { %949 = vst.msk [vmem:[#allocation2] sm:$0xff] %vm905_vm0, %v947_v26  ;;  %v940_v28 = vmul.f32 %v2475_v21, %v932_v27 }
 0x161   : > { %v948_v29 = vadd.f32 %v2476_v23, %v940_v28 }
 0x163   : > { %950 = vst.msk [vmem:[#allocation2 + $0x8] sm:$0xff] %vm905_vm0, %v948_v29 }
 0x164 PF: > { %v2759_v30 = vld [vmem:[%s3027_s25 + $0x8] sm:$0xff]   ;;  %v2867_v31 = vmov 0.0   ;;  %v2760_v32 = vld [vmem:[%s3027_s25] sm:$0xff]   ;;  %vm2868_vm1 = vmmov 0   ;;  %vm977_vm2 = vcmask 261120   ;;  %s3458_s4 = sld [smem:[#allocation13_spill]]  ;;  %v1035_v51 = vlaneseq }
 0x165   : > { %2616 = vmatprep.subr.bf16.mxu0 %v2867_v31  ;;  %2624 = vmatprep.subr.bf16.mxu1 %v2867_v31  ;;  %s2869_s21 = smov 96   ;;  %vm1051_vm3 = vcmask 130048   ;;  %v2870_v49 = vmov 1966171168   ;;  %s3460_s6 = sld [smem:[#allocation9_spill]]  ;;  %vm1161_vm4 = vcmask 64512  }
 0x166   : > { %2617 = vmatpush3.bf16.msra.mxu0 %v2759_v30  ;;  %2620 = vmatprep.mubr.msk.bf16.mxu0 %vm2868_vm1, %v2867_v31  ;;  %v3098_v33 = vld [vmem:[#allocation2] sm:$0xff]  ;;  %v1033_v50 = vunpack.c.l.s4 %v2870_v49  ;;  %v3134_v53 = vshrl.u32 %v1035_v51, 7  ;;  %s2871_s2 = smov 64   ;;  %s2872_s28 = smov 80   ;;  %vm1191_vm5 = vcmask 1043456   ;;  %vm1517_vm6 = vcmask 261248  }
 0x167   : > { %2618 = vmatprep.subr.bf16.mxu0 %v2867_v31  ;;  %2626 = vmatprep.mubr.msk.bf16.mxu1 %vm2868_vm1, %v2867_v31  ;;  %s2873_s30 = smov 112   ;;  %s2874_s25 = smov 48   ;;  %vm1763_vm7 = vcmask 523264  }
 0x168   : > { %v1034_v52 = vunpack.c.0.s8 %v1033_v50  ;;  %v3141_v58 = vsub.s32 0, %v3134_v53  ;;  %s2875_s8 = smov 16   ;;  %p2508_p5 = scmp.ne.s32.totalorder %s3011_s26, 1 }
 0x16a   : > { %v3100_v34 = vld [vmem:[#allocation2 + $0x8] sm:$0xff]  ;;  %2619 = vmatpush3.bf16.msra.mxu0 %v2760_v32  ;;  %s3459_s0 = scalar_lea.vmem %s3458_s4, %s3017_s27  ;;  %v1037_v54 = vsub.s32 %v1034_v52, %v3134_v53 }
 0x16b   : > { %v953_v35 = vpack.c.bf16 %v3100_v34, %v3098_v33  ;;  %2630 = vmatprep.subr.bf16.mxu0 %v2867_v31  ;;  %v2477_v36 = vld [vmem:[%s3459_s0] ss:$0 sm:$0xff]  ;;  %s3464_s0 = sld [smem:[#allocation18_spill]] (!%p2508_p5) }
 0x16c   : > { %v2481_v55 = vld.sshfl [vmem:[%s3460_s6] sm:$0x11 pattern:$0x75316420]  ;;  %s3463_s6 = scalar_lea.vmem %s3411_s9, %s3017_s27 }
 0x16d   : > { %2621 = vmatmul.mubr.msk.bf16.vlgmr.msra.gmra.mxu0 %vm977_vm2, %v953_v35  ;;  %v1031_v56 = vcombine.high %v2481_v55, %v2481_v55  ;;  %v1038_v57 = vrot.slane %v2481_v55, %v1037_v54 }
 0x16e   : > { %2632 = vmatprep.mubr.msk.bf16.mxu0 %vm2868_vm1, %v2867_v31 }
 0x16f   : > { %v3144_v59 = vrot.slane %v1038_v57, %v3141_v58  ;;  %v1045_v60 = vrot.slane %v1031_v56, %v1037_v54 }
 0x171   : > { %v3148_v1 = vrot.slane %v1045_v60, %v3141_v58 }
 0x22d   : > { %v1015_v37 = vpop.f32.mrf.mxu0 }
 0x22e   : > { %v1016_v38 = vadd.f32 %v2477_v36, %v1015_v37 }
 0x22f   : > { %v2622_v39 = vpop.f32.mrf.mxu0 }
 0x230   : > { %v3116_v40 = vpack.c.bf16 %v1016_v38, %v1016_v38 }
 0x231   : > { %v1018_v41 = vpop.f32.mrf.mxu0 }
 0x232   : > { %v1019_v42 = vadd.f32 %v2477_v36, %v1018_v41  ;;  %1049 = vrot.lane.b32.xlu0 %v3116_v40, %s2869_s21 }
 0x233   : > { %v2623_v43 = vpop.f32.mrf.mxu0 }
 0x234   : > { %v3119_v44 = vpack.c.bf16 %v1019_v42, %v1019_v42 }
 0x236   : > { %1099 = vrot.lane.b32.xlu0 %v3119_v44, %s2869_s21 }
 0x2a4   : > { %v1050_v45 = vpop.permute.xlu0 %1049 }
 0x2a5   : > { %v1056_v46 = vsel %vm1051_vm3, %v1050_v45, 0 }
 0x2a6   : > { %2625 = vmatpush3.bf16.xpose.msra.mxu1 %v1056_v46 }
 0x2a7   : > { %2636 = vmatprep.subr.bf16.mxu1 %v2867_v31 }
 0x2a8   : > { %v1100_v47 = vpop.permute.xlu0 %1099 }
 0x2a9   : > { %v1105_v48 = vsel %vm1051_vm3, %v1100_v47, 0 }
 0x2aa   : > { %2631 = vmatpush3.bf16.xpose.msra.mxu0 %v1105_v48 }
 0x2ab   : > { %2642 = vmatprep.subr.bf16.mxu0 %v2867_v31 }
 0x2ad   : > { %2627 = vmatmul.mubr.msk.bf16.vlgmr.msra.gmra.mxu1 %vm1051_vm3, %v3116_v40 }
 0x2ae   : > { %2638 = vmatprep.mubr.msk.bf16.mxu1 %vm2868_vm1, %v2867_v31 }
 0x2b1   : > { %2633 = vmatmul.mubr.msk.bf16.vlgmr.msra.gmra.mxu0 %vm1051_vm3, %v3119_v44 }
 0x2b2   : > { %2644 = vmatprep.mubr.msk.bf16.mxu0 %vm2868_vm1, %v2867_v31 }
 0x36d   : > { %v1092_v61 = vpop.f32.mrf.mxu1 }
 0x36e   : > { %v1147_v62 = vmul.f32 0.25, %v1092_v61 }
 0x36f   : > { %v2628_v63 = vpop.f32.mrf.mxu1 }
 0x370   : > { %v1159_v0 = vadd.f32 %v3144_v59, %v1147_v62 }
 0x371   : > { %v1095_v2 = vpop.f32.mrf.mxu1  ;;  %v1141_v3 = vpop.f32.mrf.mxu0 }
 0x372   : > { %v1148_v4 = vmul.f32 0.25, %v1141_v3  ;;  %v1162_v5 = vsel %vm1161_vm4, %v1159_v0, -inf }
 0x373   : > { %1163 = vmax.xlane.f32.xlu1 %v1162_v5  ;;  %v2629_v6 = vpop.f32.mrf.mxu1  ;;  %v2634_v7 = vpop.f32.mrf.mxu0 }
 0x374   : > { %v1160_v8 = vadd.f32 %v3148_v1, %v1148_v4 }
 0x375   : > { %v1144_v9 = vpop.f32.mrf.mxu0 }
 0x376   : > { %v1165_v10 = vsel %vm1161_vm4, %v1160_v8, -inf }
 0x377   : > { %1166 = vmax.xlane.f32.xlu1 %v1165_v10  ;;  %v2635_v11 = vpop.f32.mrf.mxu0 }
 0x388   : > { %1186 = vrot.lane.b32.xlu1 %v3116_v40, %s2871_s2 }
 0x38c   : > { %1235 = vrot.lane.b32.xlu1 %v3119_v44, %s2871_s2  ;;  %s3469_s2 = sld [smem:[#allocation21_spill]] (!%p2508_p5) }
 0x390   : > { %1287 = vrot.lane.b32.xlu1 %v3116_v40, %s2872_s28 }
 0x3fc   : > { %v1164_v12 = vpop.xlane.xlu1 %1163 }
 0x3fd   : > { %v1168_v13 = vsub.f32 %v1159_v0, %v1164_v12 }
 0x3ff   : > { %v1170_v14 = vmul.f32 1.442695, %v1168_v13 }
 0x400   : > { %v1167_v15 = vpop.xlane.xlu1 %1166 }
 0x401   : > { %2769 = vpow2.f32 %v1170_v14  ;;  %v1169_v16 = vsub.f32 %v1160_v8, %v1167_v15 }
 0x403   : > { %v1172_v17 = vmul.f32 1.442695, %v1169_v16 }
 0x404   : > { %v1187_v18 = vpop.permute.xlu1 %1186 }
 0x405   : > { %2771 = vpow2.f32 %v1172_v17  ;;  %v1193_v19 = vsel %vm1191_vm5, %v1187_v18, 0 }
 0x406   : > { %2637 = vmatpush3.bf16.msra.mxu1 %v1193_v19 }
 0x407   : > { %2648 = vmatprep.subr.bf16.mxu1 %v2867_v31 }
 0x408   : > { %v1236_v20 = vpop.permute.xlu1 %1235 }
 0x409   : > { %v1241_v21 = vsel %vm1191_vm5, %v1236_v20, 0 }
 0x40a   : > { %2643 = vmatpush3.bf16.msra.mxu0 %v1241_v21 }
 0x40b   : > { %2654 = vmatprep.subr.bf16.mxu0 %v2867_v31 }
 0x40c   : > { %v1288_v26 = vpop.permute.xlu1 %1287 }
 0x40d   : > { %v1293_v36 = vsel %vm1051_vm3, %v1288_v26, 0  ;;  %v2762_v26 = vld [vmem:[%s3032_s5] sm:$0xff]  }
 0x40e   : > { %v2770_v22 = vpop.eup %2769 }
 0x40f   : > { %v1174_v23 = vsel %vm1161_vm4, %v2770_v22, 0.0 }
 0x410   : > { %1175 = vadd.xlane.f32.xlu0 %v1174_v23 }
 0x412   : > { %v2772_v24 = vpop.eup %2771 }
 0x413   : > { %v1177_v25 = vsel %vm1161_vm4, %v2772_v24, 0.0 }
 0x414   : > { %1178 = vadd.xlane.f32.xlu1 %v1177_v25  ;;  %v2761_v25 = vld [vmem:[%s3032_s5 + $0x8] sm:$0xff]  }
 0x425   : > { %1337 = vrot.lane.b32.xlu1 %v3119_v44, %s2872_s28  ;;  %s3470_s28 = sld [smem:[#allocation23_spill]] (!%p2508_p5) }
 0x426   : > { %1285 = vrot.lane.b32.xlu0 %v3116_v40, %s2873_s30 }
 0x429   : > { %1335 = vrot.lane.b32.xlu1 %v3119_v44, %s2873_s30 }
 0x499   : > { %v1176_v27 = vpop.xlane.xlu0 %1175 }
 0x49a   : > { %2773 = vrcp.f32 %v1176_v27 }
 0x49d   : > { %v1179_v28 = vpop.xlane.xlu1 %1178  ;;  %v1286_v42 = vpop.permute.xlu0 %1285 }
 0x49e   : > { %2775 = vrcp.f32 %v1179_v28 }
 0x4a1   : > { %v1338_v38 = vpop.permute.xlu1 %1337 }
 0x4a2   : > { %v1343_v41 = vsel %vm1051_vm3, %v1338_v38, 0 }
 0x4a5   : > { %v1336_v43 = vpop.permute.xlu1 %1335 }
 0x4a7   : > { %v2774_v29 = vpop.eup %2773 }
 0x4a8   : > { %v1182_v30 = vmul.f32 %v2774_v29, %v2770_v22 }
 0x4aa   : > { %v1184_v32 = vpack.c.bf16 %v1182_v30, %v1182_v30 }
 0x4ab   : > { %v2776_v35 = vpop.eup %2775 }
 0x4ac   : > { %2639 = vmatmul.mubr.msk.bf16.vlgmr.msra.gmra.mxu1 %vm1161_vm4, %v1184_v32  ;;  %v1183_v37 = vmul.f32 %v2776_v35, %v2772_v24 }
 0x4ad   : > { %2649 = vmatpush3.bf16.xpose.msra.mxu1 %v1293_v36  ;;  %2650 = vmatprep.mubr.msk.bf16.mxu1 %vm2868_vm1, %v2867_v31 }
 0x4ae   : > { %v1185_v39 = vpack.c.bf16 %v1183_v37, %v1183_v37  ;;  %2660 = vmatprep.subr.bf16.mxu1 %v2867_v31 }
 0x4b0   : > { %2645 = vmatmul.mubr.msk.bf16.vlgmr.msra.gmra.mxu0 %vm1161_vm4, %v1185_v39 }
 0x4b1   : > { %2655 = vmatpush3.bf16.xpose.msra.mxu0 %v1343_v41  ;;  %2656 = vmatprep.mubr.msk.bf16.mxu0 %vm2868_vm1, %v2867_v31 }
 0x4b2   : > { %2666 = vmatprep.subr.bf16.mxu0 %v2867_v31 }
 0x4b4   : > { %2651 = vmatmul.mubr.msk.bf16.vlgmr.msra.gmra.mxu1 %vm1051_vm3, %v1286_v42 }
 0x4b5   : > { %2662 = vmatprep.mubr.msk.bf16.mxu1 %vm2868_vm1, %v2867_v31 }
 0x4b8   : > { %2657 = vmatmul.mubr.msk.bf16.vlgmr.msra.gmra.mxu0 %vm1051_vm3, %v1336_v43 }
 0x4b9   : > { %2668 = vmatprep.mubr.msk.bf16.mxu0 %vm2868_vm1, %v2867_v31 }
 0x56c   : > { %v1229_v45 = vpop.f32.mrf.mxu1 }
 0x56d   : > { %1283 = vst.msk [vmem:[#allocation3] sm:$0xff] %vm1051_vm3, %v1229_v45  ;;  %v2490_v45 = vld [vmem:[%s867_s19] ss:$0 sm:$0xff] }
 0x56e   : > { %v2640_v46 = vpop.f32.mrf.mxu1 }
 0x570   : > { %v1232_v47 = vpop.f32.mrf.mxu1  ;;  %v1277_v48 = vpop.f32.mrf.mxu0 }
 0x571   : > { %1284 = vst.msk [vmem:[#allocation3 + $0x8] sm:$0xff] %vm1051_vm3, %v1277_v48 }
 0x572   : > { %v2641_v49 = vpop.f32.mrf.mxu1  ;;  %v2646_v50 = vpop.f32.mrf.mxu0 }
 0x574   : > { %v1280_v51 = vpop.f32.mrf.mxu0  ;;  %v1329_v52 = vpop.f32.mrf.mxu1 }
 0x575   : > { %v1385_v54 = vmul.f32 0.25, %v1329_v52 }
 0x576   : > { %v2647_v55 = vpop.f32.mrf.mxu0  ;;  %v2652_v56 = vpop.f32.mrf.mxu1 }
 0x577   : > { %v1387_v57 = vadd.f32 %v1385_v54, %v3144_v59 }
 0x578   : > { %v1332_v60 = vpop.f32.mrf.mxu1  ;;  %v1379_v61 = vpop.f32.mrf.mxu0 }
 0x579   : > { %v1386_v62 = vmul.f32 0.25, %v1379_v61  ;;  %v1389_v63 = vsel %vm1161_vm4, %v1387_v57, -inf }
 0x57a   : > { %1390 = vmax.xlane.f32.xlu1 %v1389_v63  ;;  %v2653_v0 = vpop.f32.mrf.mxu1  ;;  %v2658_v2 = vpop.f32.mrf.mxu0 }
 0x57b   : > { %v1388_v3 = vadd.f32 %v1386_v62, %v3148_v1 }
 0x57c   : > { %v1382_v4 = vpop.f32.mrf.mxu0 }
 0x57d   : > { %v1392_v5 = vsel %vm1161_vm4, %v1388_v3, -inf }
 0x57e   : > { %1393 = vmax.xlane.f32.xlu0 %v1392_v5  ;;  %v2659_v6 = vpop.f32.mrf.mxu0  ;;  %v2764_v5 = vld [vmem:[%s3049_s3] sm:$0xff]  }
 0x594   : > { %1461 = vrot.lane.b32.xlu0 %v3119_v44, %s2874_s25 }
 0x603   : > { %v1391_v7 = vpop.xlane.xlu1 %1390 }
 0x604   : > { %v1395_v59 = vsub.f32 %v1387_v57, %v1391_v7 }
 0x606   : > { %v1397_v8 = vmul.f32 1.442695, %v1395_v59 }
 0x607   : > { %v1394_v9 = vpop.xlane.xlu0 %1393 }
 0x608   : > { %2777 = vpow2.f32 %v1397_v8  ;;  %v1396_v10 = vsub.f32 %v1388_v3, %v1394_v9 }
 0x60a   : > { %v1399_v11 = vmul.f32 1.442695, %v1396_v10 }
 0x60b   : > { %v1462_v12 = vpop.permute.xlu0 %1461 }
 0x60c   : > { %2779 = vpow2.f32 %v1399_v11  ;;  %v1467_v13 = vsel %vm1191_vm5, %v1462_v12, 0 }
 0x60d   : > { %2667 = vmatpush3.bf16.msra.mxu0 %v1467_v13  ;;  %v2494_v13 = vld [vmem:[%s870_s18] ss:$0 sm:$0xff] }
 0x60e   : > { %2680 = vmatprep.subr.bf16.mxu0 %v2867_v31 }
 0x615   : > { %v2778_v1 = vpop.eup %2777 }
 0x616   : > { %v1401_v14 = vsel %vm1161_vm4, %v2778_v1, 0.0 }
 0x617   : > { %1402 = vadd.xlane.f32.xlu1 %v1401_v14 }
 0x619   : > { %v2780_v15 = vpop.eup %2779 }
 0x61a   : > { %v1404_v44 = vsel %vm1161_vm4, %v2780_v15, 0.0 }
 0x61b   : > { %1405 = vadd.xlane.f32.xlu1 %v1404_v44  ;;  %v2495_v44 = vld [vmem:[%s3463_s6] ss:$0 sm:$0xff]  ;;  %s3467_s6 = sld [smem:[#allocation22_spill]] (!%p2508_p5) }
 0x62c   : > { %1413 = vrot.lane.b32.xlu1 %v3116_v40, %s2874_s25 }
 0x6a0   : > { %v1403_v16 = vpop.xlane.xlu1 %1402 }
 0x6a1   : > { %2781 = vrcp.f32 %v1403_v16 }
 0x6a4   : > { %v1406_v17 = vpop.xlane.xlu1 %1405 }
 0x6a5   : > { %2783 = vrcp.f32 %v1406_v17 }
 0x6a8   : > { %v1414_v18 = vpop.permute.xlu1 %1413 }
 0x6a9   : > { %v1419_v19 = vsel %vm1191_vm5, %v1414_v18, 0 }
 0x6aa   : > { %2661 = vmatpush3.bf16.msra.mxu1 %v1419_v19 }
 0x6ab   : > { %2672 = vmatprep.subr.bf16.mxu1 %v2867_v31 }
 0x6ae   : > { %v2782_v20 = vpop.eup %2781 }
 0x6af   : > { %v1409_v21 = vmul.f32 %v2782_v20, %v2778_v1  ;;  %v2765_v20 = vld [vmem:[%s3059_s24 + $0x18] sm:$0xff]  }
 0x6b1   : > { %v1411_v22 = vpack.c.bf16 %v1409_v21, %v1409_v21  ;;  %v2766_v21 = vld [vmem:[%s3059_s24 + $0x10] sm:$0xff]  }
 0x6b2   : > { %v2784_v23 = vpop.eup %2783 }
 0x6b3   : > { %2663 = vmatmul.mubr.msk.bf16.vlgmr.msra.gmra.mxu1 %vm1161_vm4, %v1411_v22  ;;  %v1410_v24 = vmul.f32 %v2784_v23, %v2780_v15  ;;  %v2767_v22 = vld [vmem:[%s3059_s24 + $0x8] sm:$0xff]   ;;  %v2768_v23 = vld [vmem:[%s3059_s24] sm:$0xff]  }
 0x6b4   : > { %2676 = vmatprep.mubr.msk.bf16.mxu1 %vm2868_vm1, %v2867_v31  ;;  %2673 = vmatpush3.bf16.msra.mxu1 %v2761_v25 }
 0x6b5   : > { %v1412_v40 = vpack.c.bf16 %v1410_v24, %v1410_v24  ;;  %2674 = vmatprep.subr.bf16.mxu1 %v2867_v31  ;;  %v2496_v24 = vld [vmem:[%s881_s1] ss:$0 sm:$0xff]  ;;  %s3465_s1 = sld [smem:[#allocation20_spill]] (!%p2508_p5) }
 0x6b7   : > { %2669 = vmatmul.mubr.msk.bf16.vlgmr.msra.gmra.mxu0 %vm1161_vm4, %v1412_v40 }
 0x6b8   : > { %2684 = vmatprep.mubr.msk.bf16.mxu0 %vm2868_vm1, %v2867_v31  ;;  %2675 = vmatpush3.bf16.msra.mxu1 %v2762_v26 }
 0x6b9   : > { %2688 = vmatprep.subr.bf16.mxu1 %v2867_v31 }
 0x773   : > { %v1455_v27 = vpop.f32.mrf.mxu1 }
 0x774   : > { %1511 = vrot.lane.b32.xlu1 %v1455_v27, %s2875_s8 }
 0x775   : > { %v2664_v28 = vpop.f32.mrf.mxu1 }
 0x777   : > { %v1458_v29 = vpop.f32.mrf.mxu1  ;;  %v1503_v30 = vpop.f32.mrf.mxu0 }
 0x778   : > { %1513 = vrot.lane.b32.xlu1 %v1503_v30, %s2875_s8 }
 0x779   : > { %v2665_v32 = vpop.f32.mrf.mxu1  ;;  %v2670_v35 = vpop.f32.mrf.mxu0 }
 0x77b   : > { %v1506_v36 = vpop.f32.mrf.mxu0 }
 0x77d   : > { %v2671_v37 = vpop.f32.mrf.mxu0 }
 0x7e6   : > { %v1512_v38 = vpop.permute.xlu1 %1511 }
 0x7e7   : > { %1518 = vst.msk [vmem:[#allocation3] sm:$0xff] %vm1517_vm6, %v1512_v38 }
 0x7ea   : > { %v1514_v39 = vpop.permute.xlu1 %1513 }
 0x7eb   : > { %1519 = vst.msk [vmem:[#allocation3 + $0x8] sm:$0xff] %vm1517_vm6, %v1514_v39 }
 0x7ee   : > { %v1520_v41 = vld [vmem:[#allocation3] sm:$0xff] }
 0x7f2   : > { %v1521_v42 = vld [vmem:[#allocation3 + $0x8] sm:$0xff] }
 0x7f3   : > { %v1522_v43 = vpack.c.bf16 %v1521_v42, %v1520_v41 }
 0x7f5   : > { %2677 = vmatmul.mubr.msk.bf16.vlgmr.msra.gmra.mxu1 %vm977_vm2, %v1522_v43 }
 0x7f6   : > { %2696 = vmatprep.mubr.msk.bf16.mxu1 %vm2868_vm1, %v2867_v31  ;;  %2689 = vmatpush3.bf16.msra.mxu1 %v2765_v20 }
 0x7f7   : > { %2690 = vmatprep.subr.bf16.mxu1 %v2867_v31 }
 0x7fa   : > { %2691 = vmatpush3.bf16.msra.mxu1 %v2766_v21 }
 0x7fb   : > { %2692 = vmatprep.subr.bf16.mxu1 %v2867_v31 }
 0x7fe   : > { %2693 = vmatpush3.bf16.msra.mxu1 %v2767_v22 }
 0x7ff   : > { %2694 = vmatprep.subr.bf16.mxu1 %v2867_v31 }
 0x802   : > { %2695 = vmatpush3.bf16.msra.mxu1 %v2768_v23 }
 0x8b5   : > { %v1583_v46 = vpop.f32.mrf.mxu1 }
 0x8b6   : > { %v1584_v47 = vadd.f32 %v2490_v45, %v1583_v46 }
 0x8b7   : > { %v2678_v48 = vpop.f32.mrf.mxu1 }
 0x8b8   : > { %v1590_v49 = vadd.f32 %v1584_v47, %v3098_v33 }
 0x8b9   : > { %v1586_v50 = vpop.f32.mrf.mxu1 }
 0x8ba   : > { %v1587_v51 = vadd.f32 %v2490_v45, %v1586_v50  ;;  %v1594_v52 = vsel %vm977_vm2, %v1590_v49, 0.0 }
 0x8bb   : > { %1595 = vadd.xlane.f32.xlu0 %v1594_v52  ;;  %v2679_v54 = vpop.f32.mrf.mxu1 }
 0x8bc   : > { %v1591_v55 = vadd.f32 %v1587_v51, %v3100_v34  ;;  %v2763_v34 = vld [vmem:[%s3049_s3 + $0x8] sm:$0xff]   ;;  %v2500_v54 = vld [vmem:[%s889_s22] ss:$0 sm:$0xff] }
 0x8bd   : > { %2681 = vmatpush3.bf16.msra.mxu0 %v2763_v34 }
 0x8be   : > { %v1597_v56 = vsel %vm977_vm2, %v1591_v55, 0.0  ;;  %2682 = vmatprep.subr.bf16.mxu0 %v2867_v31 }
 0x8bf   : > { %1598 = vadd.xlane.f32.xlu1 %v1597_v56 }
 0x8c1   : > { %2683 = vmatpush3.bf16.msra.mxu0 %v2764_v5 }
 0x944   : > { %v1596_v57 = vpop.xlane.xlu0 %1595 }
 0x945   : > { %v1601_v60 = vmul.f32 0.03125, %v1596_v57 }
 0x947   : > { %v1603_v61 = vsub.f32 %v1590_v49, %v1601_v60 }
 0x948   : > { %v1599_v62 = vpop.xlane.xlu1 %1598 }
 0x949   : > { %v1602_v63 = vmul.f32 0.03125, %v1599_v62  ;;  %v1605_v0 = vmul.f32 %v1603_v61, %v1603_v61 }
 0x94b   : > { %v1604_v33 = vsub.f32 %v1591_v55, %v1602_v63  ;;  %v1607_v2 = vsel %vm977_vm2, %v1605_v0, 0.0 }
 0x94c   : > { %1608 = vadd.xlane.f32.xlu0 %v1607_v2 }
 0x94d   : > { %v1606_v3 = vmul.f32 %v1604_v33, %v1604_v33 }
 0x94f   : > { %v1610_v4 = vsel %vm977_vm2, %v1606_v3, 0.0 }
 0x950   : > { %1611 = vadd.xlane.f32.xlu0 %v1610_v4 }
 0x9d5   : > { %v1609_v6 = vpop.xlane.xlu0 %1608 }
 0x9d6   : > { %v1613_v7 = vmul.f32 0.03125, %v1609_v6 }
 0x9d8   : > { %v1615_v59 = vadd.f32 1e-12, %v1613_v7 }
 0x9d9   : > { %v1612_v8 = vpop.xlane.xlu0 %1611 }
 0x9da   : > { %2785 = vrsqrt.f32 %v1615_v59  ;;  %v1614_v9 = vmul.f32 0.03125, %v1612_v8 }
 0x9dc   : > { %v1616_v10 = vadd.f32 1e-12, %v1614_v9 }
 0x9de   : > { %2787 = vrsqrt.f32 %v1616_v10 }
 0x9e7   : > { %v2786_v11 = vpop.eup %2785 }
 0x9e8   : > { %v1619_v12 = vmul.f32 %v2786_v11, %v1603_v61 }
 0x9ea   : > { %v1627_v15 = vmul.f32 %v2494_v13, %v1619_v12 }
 0x9eb   : > { %v2788_v1 = vpop.eup %2787 }
 0x9ec   : > { %v1620_v14 = vmul.f32 %v2788_v1, %v1604_v33  ;;  %v1635_v17 = vadd.f32 %v2495_v44, %v1627_v15 }
 0x9ee   : > { %v1628_v16 = vmul.f32 %v2494_v13, %v1620_v14 }
 0x9f0   : > { %v1636_v18 = vadd.f32 %v2495_v44, %v1628_v16  ;;  %v2506_v16 = vld [vmem:[%s892_s7] ss:$0 sm:$0xff]  ;;  %s3466_s7 = sld [smem:[#allocation17_spill]] (!%p2508_p5) }
 0x9f2   : > { %v1637_v19 = vpack.c.bf16 %v1636_v18, %v1635_v17 }
 0x9f4   : > { %2685 = vmatmul.mubr.msk.bf16.vlgmr.msra.gmra.mxu0 %vm977_vm2, %v1637_v19 }
 0xab4   : > { %v1698_v40 = vpop.f32.mrf.mxu0 }
 0xab5   : > { %v1699_v25 = vadd.f32 %v2496_v24, %v1698_v40 }
 0xab6   : > { %v2686_v26 = vpop.f32.mrf.mxu0 }
 0xab7   : > { %v1707_v27 = vmul.f32 0.044715, %v1699_v25  ;;  %v1705_v47 = vmul.f32 0.5, %v1699_v25 }
 0xab8   : > { %v1701_v28 = vpop.f32.mrf.mxu0 }
 0xab9   : > { %v1709_v29 = vmul.f32 %v1707_v27, %v1699_v25  ;;  %v1702_v30 = vadd.f32 %v2496_v24, %v1701_v28 }
 0xaba   : > { %v2687_v32 = vpop.f32.mrf.mxu0 }
 0xabb   : > { %v1711_v35 = vmul.f32 %v1709_v29, %v1699_v25  ;;  %v1708_v36 = vmul.f32 0.044715, %v1702_v30  ;;  %v1706_v48 = vmul.f32 0.5, %v1702_v30 }
 0xabd   : > { %v1713_v37 = vadd.f32 %v1711_v35, %v1699_v25  ;;  %v1710_v38 = vmul.f32 %v1708_v36, %v1702_v30 }
 0xabf   : > { %v1715_v39 = vmul.f32 0.7978846, %v1713_v37  ;;  %v1712_v31 = vmul.f32 %v1710_v38, %v1702_v30 }
 0xac1   : > { %2789 = vtanh.f32 %v1715_v39  ;;  %v1714_v41 = vadd.f32 %v1712_v31, %v1702_v30 }
 0xac3   : > { %v1716_v42 = vmul.f32 0.7978846, %v1714_v41 }
 0xac5   : > { %2791 = vtanh.f32 %v1716_v42 }
 0xace   : > { %v2790_v43 = vpop.eup %2789 }
 0xacf   : > { %v1719_v45 = vadd.f32 1.0, %v2790_v43 }
 0xad1   : > { %v1721_v50 = vmul.f32 %v1719_v45, %v1705_v47 }
 0xad2   : > { %v2792_v46 = vpop.eup %2791 }
 0xad3   : > { %v1720_v49 = vadd.f32 1.0, %v2792_v46 }
 0xad5   : > { %v1722_v51 = vmul.f32 %v1720_v49, %v1706_v48 }
 0xad7   : > { %v1723_v52 = vpack.c.bf16 %v1722_v51, %v1721_v50 }
 0xad9   : > { %2697 = vmatmul.mubr.msk.bf16.vlgmr.msra.gmra.mxu1 %vm1763_vm7, %v1723_v52 }
 0xb99   : > { %v1801_v55 = vpop.f32.mrf.mxu1 }
 0xb9a   : > { %v1802_v56 = vadd.f32 %v2500_v54, %v1801_v55 }
 0xb9b   : > { %v2698_v57 = vpop.f32.mrf.mxu1 }
 0xb9c   : > { %v1808_v60 = vadd.f32 %v1802_v56, %v1635_v17 }
 0xb9d   : > { %v1804_v61 = vpop.f32.mrf.mxu1 }
 0xb9e   : > { %v1805_v62 = vadd.f32 %v2500_v54, %v1804_v61  ;;  %v1812_v63 = vsel %vm977_vm2, %v1808_v60, 0.0 }
 0xb9f   : > { %1813 = vadd.xlane.f32.xlu1 %v1812_v63  ;;  %v2699_v0 = vpop.f32.mrf.mxu1 }
 0xba0   : > { %v1809_v33 = vadd.f32 %v1805_v62, %v1636_v18  ;;  %v2507_v18 = vld [vmem:[%s895_s29] ss:$0 sm:$0xff]  ;;  %s3468_s29 = sld [smem:[#allocation19_spill]] (!%p2508_p5) }
 0xba2   : > { %v1815_v2 = vsel %vm977_vm2, %v1809_v33, 0.0 }
 0xba3   : > { %1816 = vadd.xlane.f32.xlu0 %v1815_v2 }
 0xc28   : > { %v1814_v3 = vpop.xlane.xlu1 %1813 }
 0xc29   : > { %v1818_v4 = vmul.f32 0.03125, %v1814_v3 }
 0xc2b   : > { %v1820_v34 = vsub.f32 %v1808_v60, %v1818_v4 }
 0xc2c   : > { %v1817_v5 = vpop.xlane.xlu0 %1816 }
 0xc2d   : > { %v1819_v6 = vmul.f32 0.03125, %v1817_v5  ;;  %v1822_v7 = vmul.f32 %v1820_v34, %v1820_v34 }
 0xc2f   : > { %v1821_v59 = vsub.f32 %v1809_v33, %v1819_v6  ;;  %v1824_v8 = vsel %vm977_vm2, %v1822_v7, 0.0 }
 0xc30   : > { %1825 = vadd.xlane.f32.xlu1 %v1824_v8 }
 0xc31   : > { %v1823_v9 = vmul.f32 %v1821_v59, %v1821_v59 }
 0xc33   : > { %v1827_v10 = vsel %vm977_vm2, %v1823_v9, 0.0 }
 0xc34   : > { %1828 = vadd.xlane.f32.xlu0 %v1827_v10 }
 0xcb9   : > { %v1826_v11 = vpop.xlane.xlu1 %1825 }
 0xcba   : > { %v1830_v12 = vmul.f32 0.03125, %v1826_v11 }
 0xcbc   : > { %v1832_v13 = vadd.f32 1e-12, %v1830_v12 }
 0xcbd   : > { %v1829_v1 = vpop.xlane.xlu0 %1828 }
 0xcbe   : > { %2793 = vrsqrt.f32 %v1832_v13  ;;  %v1831_v14 = vmul.f32 0.03125, %v1829_v1 }
 0xcc0   : > { %v1833_v15 = vadd.f32 1e-12, %v1831_v14 }
 0xcc2   : > { %2795 = vrsqrt.f32 %v1833_v15 }
 0xccb   : > { %v2794_v44 = vpop.eup %2793 }
 0xccc   : > { %v1836_v17 = vmul.f32 %v2794_v44, %v1820_v34 }
 0xcce   : > { %v1844_v19 = vmul.f32 %v2506_v16, %v1836_v17 }
 0xccf   : > { %v2796_v20 = vpop.eup %2795 }
 0xcd0   : > { %v1852_v21 = vadd.f32 %v2507_v18, %v1844_v19  ;;  %v1837_v22 = vmul.f32 %v2796_v20, %v1821_v59 }
 0xcd2   : > { %1854 = vst.msk [vmem:[#allocation2] sm:$0xff] %vm977_vm2, %v1852_v21  ;;  %v1845_v23 = vmul.f32 %v2506_v16, %v1837_v22  ;;  %1859 = sbr.rel (%p2508_p5) target bundleno = 4111 (0x100f), region = 124 }
 0xcd4   : > { %v1853_v24 = vadd.f32 %v2507_v18, %v1845_v23 }
 0xcd6   : > { %1855 = vst.msk [vmem:[#allocation2 + $0x8] sm:$0xff] %vm977_vm2, %v1853_v24 }
 0xcd7   : > { %v2797_v40 = vld [vmem:[%s3418_s16 + $0x8] sm:$0xff]   ;;  %v2876_v25 = vmov 0.0   ;;  %v2798_v26 = vld [vmem:[%s3418_s16] sm:$0xff]   ;;  %vm2877_vm8 = vmmov 0   ;;  %v1861_v27 = vrot.slane %v1853_v24, 7  ;;  %vm1863_vm9 = vcmask 1040384  }
 0xcd8   : > { %2700 = vmatprep.subr.bf16.mxu0 %v2876_v25  ;;  %2704 = vmatprep.mubr.msk.bf16.mxu0 %vm2877_vm8, %v2876_v25  ;;  %v2799_v30 = vld [vmem:[%s3464_s0 + $0x14] ss:$8 sps:$4 sm:$0xff]   ;;  %v2801_v32 = vld [vmem:[%s3464_s0 + $0x10] ss:$8 sps:$4 sm:$0xff]   ;;  %v2802_v35 = vld [vmem:[%s3464_s0 + $0x4] ss:$8 sps:$4 sm:$0xff]  }
 0xcd9   : > { %2701 = vmatpush3.bf16.msra.mxu0 %v2797_v40  ;;  %v1864_v28 = vsel %vm1863_vm9, %v1852_v21, %v1861_v27  ;;  %1985 = vmatprep.subr.bf16.mxu1 %v2799_v30  ;;  %v2878_v36 = vmov 0   ;;  %v2804_v37 = vld [vmem:[%s3464_s0] ss:$8 sps:$4 sm:$0xff]   ;;  %v2805_v38 = vld [vmem:[%s3465_s1 + $0x78] sm:$0xff]   ;;  %v2807_v31 = vld [vmem:[%s3465_s1 + $0x70] sm:$0xff]   ;;  %v1946_v7 = vsub.s32 1, %v3134_v53 }
 0xcda   : > { %2702 = vmatprep.subr.bf16.mxu0 %v2876_v25  ;;  %v1865_v29 = vpack.c.bf16 %v1864_v28, %v1864_v28  ;;  %2005 = vmatprep.mubr.bf16.mxu1 %v2878_v36  ;;  %v2806_v39 = vld [vmem:[%s3465_s1 + $0x38] sm:$0xff]   ;;  %v2808_v41 = vld [vmem:[%s3465_s1 + $0x30] sm:$0xff]   ;;  %v2809_v42 = vld [vmem:[%s3465_s1 + $0x68] sm:$0xff]   ;;  %vm2306_vm10 = vcmask 17408  }
 0xcdb   : > { %1986 = vmatpush1.bf16.msra.mxu1 %v2801_v32  ;;  %v2810_v43 = vld [vmem:[%s3465_s1 + $0x28] sm:$0xff]   ;;  %v2811_v45 = vld [vmem:[%s3465_s1 + $0x60] sm:$0xff]   ;;  %v2813_v47 = vld [vmem:[%s3465_s1 + $0x58] sm:$0xff]  }
 0xcdc   : > { %1987 = vmatprep.subr.bf16.mxu1 %v2802_v35  ;;  %v2812_v46 = vld [vmem:[%s3465_s1 + $0x20] sm:$0xff]   ;;  %v2814_v48 = vld [vmem:[%s3465_s1 + $0x18] sm:$0xff]   ;;  %v2815_v49 = vld [vmem:[%s3465_s1 + $0x50] sm:$0xff]  }
 0xcdd   : > { %2703 = vmatpush3.bf16.msra.mxu0 %v2798_v26  ;;  %v2816_v50 = vld [vmem:[%s3465_s1 + $0x10] sm:$0xff]   ;;  %v2509_v51 = vld [vmem:[%s3466_s7] ss:$0 sm:$0xff]  ;;  %v2817_v62 = vld [vmem:[%s3465_s1 + $0x48] sm:$0xff]  }
 0xcde   : > { %2585 = vmatprep.subr.bf16.mxu0 %v2805_v38  ;;  %v2818_v63 = vld [vmem:[%s3465_s1 + $0x8] sm:$0xff]   ;;  %v2819_v0 = vld [vmem:[%s3465_s1 + $0x40] sm:$0xff]   ;;  %v2821_v2 = vld [vmem:[%s3467_s6 + $0x38] sm:$0xff]  }
 0xcdf   : > { %1988 = vmatpush1.bf16.msra.mxu1 %v2804_v37  ;;  %v2820_v33 = vld [vmem:[%s3465_s1] sm:$0xff]   ;;  %v2822_v3 = vld [vmem:[%s3467_s6 + $0x30] sm:$0xff]   ;;  %v2823_v4 = vld [vmem:[%s3467_s6 + $0x28] sm:$0xff]  }
 0xce0   : > { %2705 = vmatmul.mubr.msk.bf16.vlgmr.msra.gmra.mxu0 %vm977_vm2, %v1865_v29  ;;  %2708 = vmatprep.subr.bf16.mxu1 %v2876_v25  ;;  %v2824_v34 = vld [vmem:[%s3467_s6 + $0x20] sm:$0xff]   ;;  %v2825_v5 = vld [vmem:[%s3467_s6 + $0x18] sm:$0xff]   ;;  %v2826_v17 = vld [vmem:[%s3467_s6 + $0x10] sm:$0xff]  }
 0xce1   : > { %2586 = vmatpush3.bf16.msra.mxu0 %v2806_v39  ;;  %v1938_v6 = vld [vmem:[%s3468_s29] sm:$0x3]  ;;  %v2827_v53 = vld [vmem:[%s3467_s6 + $0x8] sm:$0xff]  }
 0xce2   : > { %2587 = vmatprep.subr.bf16.mxu0 %v2807_v31  ;;  %v1943_v59 = vrot.slane %v1938_v6, %v3141_v58  ;;  %v1947_v8 = vrot.slane %v1938_v6, %v1946_v7  ;;  %v2828_v58 = vld [vmem:[%s3467_s6] sm:$0xff]  }
 0xce3   : > { %v2518_v19 = vld [vmem:[%s3469_s2] ss:$0 sm:$0xff] }
 0xce5   : > { %2588 = vmatpush3.bf16.msra.mxu0 %v2808_v41 }
 0xce6   : > { %2589 = vmatprep.subr.bf16.mxu0 %v2809_v42 }
 0xce9   : > { %2590 = vmatpush3.bf16.msra.mxu0 %v2810_v43 }
 0xcea   : > { %2591 = vmatprep.subr.bf16.mxu0 %v2811_v45 }
 0xced   : > { %2592 = vmatpush3.bf16.msra.mxu0 %v2812_v46 }
 0xcee   : > { %2593 = vmatprep.subr.bf16.mxu0 %v2813_v47 }
 0xcf1   : > { %2594 = vmatpush3.bf16.msra.mxu0 %v2814_v48 }
 0xcf2   : > { %2595 = vmatprep.subr.bf16.mxu0 %v2815_v49 }
 0xcf5   : > { %2596 = vmatpush3.bf16.msra.mxu0 %v2816_v50 }
 0xcf6   : > { %2597 = vmatprep.subr.bf16.mxu0 %v2817_v62 }
 0xcf9   : > { %2598 = vmatpush3.bf16.msra.mxu0 %v2818_v63 }
 0xcfa   : > { %2599 = vmatprep.subr.bf16.mxu0 %v2819_v0 }
 0xcfd   : > { %2600 = vmatpush3.bf16.msra.mxu0 %v2820_v33 }
 0xda0   : > { %v1926_v52 = vpop.f32.mrf.mxu0 }
 0xda1   : > { %v1927_v54 = vadd.f32 %v2509_v51, %v1926_v52 }
 0xda2   : > { %v2706_v55 = vpop.f32.mrf.mxu0 }
 0xda3   : > { %2829 = vtanh.f32 %v1927_v54 }
 0xda4   : > { %v1929_v56 = vpop.f32.mrf.mxu0 }
 0xda6   : > { %v2707_v57 = vpop.f32.mrf.mxu0 }
 0xdb0   : > { %v2830_v60 = vpop.eup %2829 }
 0xdb1   : > { %v1933_v61 = vpack.c.bf16 %v2830_v60, %v2830_v60 }
 0xdb3   : > { %2517 = vmatmul.mubr.msk.bf16.vlgmr.msra.gmra.mxu1 %vm977_vm2, %v1933_v61 }
 0xdb4   : > { %2724 = vmatprep.mubr.msk.bf16.mxu1 %vm2877_vm8, %v2876_v25  ;;  %2709 = vmatpush3.bf16.msra.mxu1 %v2821_v2 }
 0xdb5   : > { %2710 = vmatprep.subr.bf16.mxu1 %v2876_v25 }
 0xdb8   : > { %2711 = vmatpush3.bf16.msra.mxu1 %v2822_v3 }
 0xdb9   : > { %2712 = vmatprep.subr.bf16.mxu1 %v2876_v25 }
 0xdbc   : > { %2713 = vmatpush3.bf16.msra.mxu1 %v2823_v4 }
 0xdbd   : > { %2714 = vmatprep.subr.bf16.mxu1 %v2876_v25 }
 0xdc0   : > { %2715 = vmatpush3.bf16.msra.mxu1 %v2824_v34 }
 0xdc1   : > { %2716 = vmatprep.subr.bf16.mxu1 %v2876_v25 }
 0xdc4   : > { %2717 = vmatpush3.bf16.msra.mxu1 %v2825_v5 }
 0xdc5   : > { %2718 = vmatprep.subr.bf16.mxu1 %v2876_v25 }
 0xdc8   : > { %2719 = vmatpush3.bf16.msra.mxu1 %v2826_v17 }
 0xdc9   : > { %2720 = vmatprep.subr.bf16.mxu1 %v2876_v25 }
 0xdcc   : > { %2721 = vmatpush3.bf16.msra.mxu1 %v2827_v53 }
 0xdcd   : > { %2722 = vmatprep.subr.bf16.mxu1 %v2876_v25  ;;  %v2535_v25 = vld [vmem:[%s3470_s28] ss:$0 sm:$0xff] }
 0xdd0   : > { %2723 = vmatpush3.bf16.msra.mxu1 %v2828_v58 }
 0xe73   : > { %v2007_v9 = vpop.f32.mrf.mxu1 }
 0xe74   : > { %v2008_v10 = vadd.f32 %v2007_v9, %v1943_v59 }
 0xe75   : > { %v2009_v11 = vpop.f32.mrf.mxu1 }
 0xe76   : > { %v2010_v12 = vadd.f32 %v2009_v11, %v1947_v8  ;;  %v2014_v13 = vmax.f32 %v2008_v10, 0.0 }
 0xe77   : > { %v2011_v1 = vpop.f32.mrf.mxu1 }
 0xe78   : > { %v2015_v14 = vmax.f32 %v2010_v12, 0.0  ;;  %v2016_v16 = vpack.c.bf16 %v2014_v13, %v2014_v13 }
 0xe79   : > { %v2012_v15 = vpop.f32.mrf.mxu1 }
 0xe7a   : > { %v2017_v44 = vpack.c.bf16 %v2015_v14, %v2015_v14 }
 0xe7c   : > { %2185 = vmatprep.mubr.bf16.mxu0 %v2017_v44 }
 0xe7d   : > { %2186 = vmatmul.mubr.bf16.vlgmr.msra.gmra.mxu0 %v2016_v16 }
 0xf3d   : > { %v2601_v18 = vpop.f32.mrf.mxu0 }
 0xf3f   : > { %v2602_v20 = vpop.f32.mrf.mxu0 }
 0xf40   : > { %v2603_v21 = vadd.f32 %v2602_v20, %v2601_v18 }
 0xf41   : > { %v2604_v22 = vpop.f32.mrf.mxu0 }
 0xf42   : > { %v2188_v23 = vadd.f32 %v2603_v21, %v2518_v19 }
 0xf43   : > { %v2605_v24 = vpop.f32.mrf.mxu0 }
 0xf44   : > { %v2193_v40 = vmax.f32 %v2188_v23, 0.0 }
 0xf46   : > { %v2194_v26 = vpack.c.bf16 %v2193_v40, %v2193_v40 }
 0xf48   : > { %2725 = vmatmul.mubr.bf16.vlgmr.msra.gmra.mxu1 %v2194_v26 }
0x1008   : > { %v2300_v27 = vpop.f32.mrf.mxu1 }
0x1009   : > { %v2301_v28 = vadd.f32 %v2535_v25, %v2300_v27 }
0x100a   : > { %v2726_v29 = vpop.f32.mrf.mxu1 }
0x100b   : > { %2307 = vst.msk [vmem:[#allocation4] sm:$0x3] %vm2306_vm10, %v2301_v28 }
0x100c   : > { %v2303_v30 = vpop.f32.mrf.mxu1 }
0x100e   : > { %v2727_v32 = vpop.f32.mrf.mxu1 }
0x100f PF: > { %p2732_p6 = scmp.eq.s32.totalorder %s3011_s26, 1  ;;  %s2879_s30 = smov [#allocation4]  }
0x1010   : > { %s2315_s25 = sshll.u32 %s2879_s30, 4  ;;  %s2316_s25 = int_to_ptr.vmem [resolvable:$true] %s2315_s25 }
0x1011   : > { %s2831_s7 = scalar_lea.vmem %s2316_s25, 32  ;;  %p2838_p10 = scmp.lt.s32.totalorder %s2316_s25, %s2316_s25 }
0x1012   : > { %p2832_p7 = scmp.ne.s32.totalorder %s2316_s25, %s2831_s7  ;;  %p2839_p11 = scmp.lt.s32.totalorder %s2831_s7, %s2831_s7 }
0x1014   : > { %p2833_p8 = pnand %p2832_p7, %p2732_p6  ;;  %p2840_p12 = por %p2839_p11, %p2838_p10 }
0x1016   : > { %p2834_p9 = pneg %p2833_p8 }
0x1018   : > { %p2841_p13 = pnand %p2840_p12, %p2834_p9 }
0x101a   : > { %2844 = shalt.err (!%p2841_p13)
}
0x101b   : > { %s3471_s29 = sld [smem:[#allocation24_spill]] }
0x1021   : > { %2729 = dma.vmem_to_hbm [thread:$0]  (%p2732_p6), %s2316_s25, 32, %s3471_s29, [#allocation5]  }
0x1022   : > { %2860 = dma.done.wait (%p2732_p6), [#allocation5], 32  }
0x1023   : > { %2862 = vsyncadd (%p2732_p6), [#allocation5], 4294967264 }
0x1024 PF: > { %s3472_s5 = sld [smem:[#allocation7_spill]] }
0x102a   : > { %s35_s5 = sadd.s32 1, %s3472_s5  }
0x102b   : > { %p32_p0 = scmp.ge.s32.totalorder %s35_s5, 4  }
0x102d   :  { %34 = sbr.rel (!%p32_p0) target bundleno = 19 (0x13), region = 184 }
0x1032   :  { %2328 = vsyncpa [#allocation5], 1 }
0x1033   :  { %2330 = vsyncpa [#allocation5 + $0x1], 1 }

</bundles_post_ra>
